<compile_context>
chip_gen: v6e
topology: v6e:2x2x1
jax: 0.10.0
libtpu: 0.0.40
codegen_flags: <defaults>
</compile_context>

<pallas_src>
import numpy as np
import jax
import jax.numpy as jnp
from jax import lax
from jax.experimental import pallas as pl
from jax.experimental.pallas import tpu as pltpu

# ----------------------------- sizes (small, test-scale) ---------------------
VOCAB = 50
EMB = 32          # embedding dim
BOW_HIDDEN = 32   # BoW hidden size (module param; branch provably dead)
HIDDEN = 32       # GRU hidden size
NUM_SENTS = 4     # S: sentences in document
DOC_LEN = 8       # L: words per sentence (padded, masked)
Q_LEN = 8         # Lq: question length

SL = NUM_SENTS * DOC_LEN        # 32 flattened document words
N_TOK = Q_LEN + SL              # 40 gathered tokens (question + document)
T_STEPS = Q_LEN + DOC_LEN       # 16 GRU steps (question tokens + summary rows)


def _r8(x):
    return ((x + 7) // 8) * 8


# ---- packed-slab layouts (every band starts on a sublane multiple of 8) ------
R_EMB = 0
R_WIH = _r8(VOCAB)                    # 56
R_WHH = R_WIH + _r8(EMB)              # 88
R_BIH = R_WHH + _r8(HIDDEN)           # 120
R_BHH = R_BIH + 8                     # 128
WS_ROWS = R_BHH + 8                   # 136
WS_COLS = 128                         # >= max(EMB, 3*HIDDEN) = 96, lane-padded

R_IDS = 0
R_MASK = _r8(N_TOK)                   # 40
XS_ROWS = _r8(R_MASK + SL)            # 72
XS_COLS = 1


# ----------------------------- Pallas kernel ---------------------------------
def encoder_kernel(wslab_ref, xslab_ref, h_out_ref):
    f32, bf16 = jnp.float32, jnp.bfloat16
    E, H = EMB, HIDDEN
    Lq, L, S = Q_LEN, DOC_LEN, NUM_SENTS

    # ---- carve the two packed slabs with static slices ----------------------
    emb_tab = wslab_ref[R_EMB:R_EMB + VOCAB, 0:E]          # (VOCAB, E) f32
    wih = wslab_ref[R_WIH:R_WIH + E, 0:3 * H]              # (E, 3H) [r|z|n]
    whh = wslab_ref[R_WHH:R_WHH + H, 0:3 * H]              # (H, 3H) [r|z|n]
    b_ih = wslab_ref[R_BIH:R_BIH + 1, 0:3 * H]             # (1, 3H)
    b_hh = wslab_ref[R_BHH:R_BHH + 1, 0:3 * H]             # (1, 3H)

    ids_f = xslab_ref[R_IDS:R_IDS + N_TOK, 0:1]            # (40, 1) exact ints in f32
    mask_f = xslab_ref[R_MASK:R_MASK + SL, 0:1]            # (32, 1)

    # ---- fused embedding gather: one-hot @ table (single MXU call, f32 exact)
    ids_i = ids_f.astype(jnp.int32)
    vocab_iota = lax.broadcasted_iota(jnp.int32, (N_TOK, VOCAB), 1)
    onehot = (ids_i == vocab_iota).astype(f32)             # (40, VOCAB)
    gathered = jnp.dot(onehot, emb_tab, preferred_element_type=f32)   # (40, E)

    emb_q = gathered[0:Lq, :]                              # (Lq, E)
    doc = gathered[Lq:Lq + SL, :] * mask_f                 # (S*L, E) masked doc emb

    # ---- document summary ----------------------------------------------------
    # Legacy nn.Softmax() over the size-1 axis of the (S,1) BoW logits is
    # identically 1.0, so the attention-weighted sum is exactly the plain sum
    # of masked sentence embeddings. Static-slice VPU adds, no matmul.
    summary = doc[0:L, :]
    for s in range(1, S):
        summary = summary + doc[s * L:(s + 1) * L, :]      # (L, E)

    # ---- GRU input-side gate pre-activations for all T steps (off the chain) -
    wih_b = wih.astype(bf16)
    gx_q = jnp.dot(emb_q.astype(bf16), wih_b, preferred_element_type=f32) + b_ih   # (Lq, 3H)
    gx_s = jnp.dot(summary.astype(bf16), wih_b, preferred_element_type=f32) + b_ih  # (L, 3H)

    # ---- serial recurrence: fully unrolled; one bf16 (1,H)@(H,3H) per step ---
    whh_b = whh.astype(bf16)
    h = jnp.zeros((1, H), f32)
    for t in range(T_STEPS):
        gx = gx_q[t:t + 1, :] if t < Lq else gx_s[t - Lq:t - Lq + 1, :]   # (1, 3H)
        gh = jnp.dot(h.astype(bf16), whh_b, preferred_element_type=f32) + b_hh
        rz = jax.nn.sigmoid(gx[:, 0:2 * H] + gh[:, 0:2 * H])             # (1, 2H)
        r = rz[:, 0:H]
        z = rz[:, H:2 * H]
        n = jnp.tanh(gx[:, 2 * H:3 * H] + r * gh[:, 2 * H:3 * H])
        h = (1.0 - z) * n + z * h
    h_out_ref[...] = h


# ----------------------------- wrapper ----------------------------------------
@jax.jit
def encoder_model_forward(params, document, mask, question):
    E, H = EMB, HIDDEN

    # trace-time weight re-layout: gate-fused, pre-transposed ([r|z|n] columns)
    wih_t = jnp.transpose(params["w_ih"], (2, 0, 1)).reshape(E, 3 * H)   # (E, 3H)
    whh_t = jnp.transpose(params["w_hh"], (2, 0, 1)).reshape(H, 3 * H)   # (H, 3H)
    b_ih = params["b_ih"].reshape(3 * H)
    b_hh = params["b_hh"].reshape(3 * H)

    # one lane/sublane-padded weight slab + one tiny data slab -> 2 input DMAs
    wslab = jnp.zeros((WS_ROWS, WS_COLS), jnp.float32)
    wslab = wslab.at[R_EMB:R_EMB + VOCAB, 0:E].set(params["embedding"])
    wslab = wslab.at[R_WIH:R_WIH + E, 0:3 * H].set(wih_t)
    wslab = wslab.at[R_WHH:R_WHH + H, 0:3 * H].set(whh_t)
    wslab = wslab.at[R_BIH, 0:3 * H].set(b_ih)
    wslab = wslab.at[R_BHH, 0:3 * H].set(b_hh)

    ids = jnp.concatenate([question.reshape(-1), document.reshape(-1)]).astype(jnp.float32)
    xslab = jnp.zeros((XS_ROWS, XS_COLS), jnp.float32)
    xslab = xslab.at[R_IDS:R_IDS + N_TOK, 0].set(ids)
    xslab = xslab.at[R_MASK:R_MASK + SL, 0].set(mask.reshape(-1).astype(jnp.float32))

    h = pl.pallas_call(
        encoder_kernel,
        out_shape=jax.ShapeDtypeStruct((1, H), jnp.float32),
        in_specs=[pl.BlockSpec(memory_space=pltpu.MemorySpace.VMEM),
                  pl.BlockSpec(memory_space=pltpu.MemorySpace.VMEM)],
        out_specs=pl.BlockSpec(memory_space=pltpu.MemorySpace.VMEM),
    )(wslab, xslab)
    # torch returns encoder_hidden of shape (num_layers=1, batch=1, hidden)
    return h.reshape(1, 1, H)


# ----------------------------- pure-JAX reference (full module math) ----------
def ref_forward(params, document, mask, question):
    emb = params["embedding"]
    emb_q = emb[question]
    emb_doc = emb[document]
    S = document.shape[0]
    bow_x = jnp.broadcast_to(jnp.mean(emb_q, 0, keepdims=True), (S, emb.shape[1]))
    emb_doc_m = emb_doc * mask[:, :, None]
    bow_s = emb_doc_m.sum(1) / mask.sum(1, keepdims=True)
    h = jnp.concatenate([bow_x, bow_s], 1)
    hid = jax.nn.relu(h @ params["w1"].T)
    logits = hid @ params["w2"].T
    prob = jax.nn.softmax(logits, axis=1)          # legacy nn.Softmax() -> dim=1
    summary = jnp.sum(prob[:, :, None] * emb_doc_m, axis=0)
    x = jnp.concatenate([emb_q, summary], 0)
    w_ih, w_hh, b_ih, b_hh = params["w_ih"], params["w_hh"], params["b_ih"], params["b_hh"]
    H = w_hh.shape[1]
    h_t = jnp.zeros((1, H), jnp.float32)
    for t in range(x.shape[0]):
        x_t = x[t:t + 1]
        r = jax.nn.sigmoid(x_t @ w_ih[0].T + b_ih[0:1] + h_t @ w_hh[0].T + b_hh[0:1])
        z = jax.nn.sigmoid(x_t @ w_ih[1].T + b_ih[1:2] + h_t @ w_hh[1].T + b_hh[1:2])
        n = jnp.tanh(x_t @ w_ih[2].T + b_ih[2:3] + r * (h_t @ w_hh[2].T + b_hh[2:3]))
        h_t = (1.0 - z) * n + z * h_t
    return h_t.reshape(1, 1, H)


# ----------------------------- main --------------------------------------------
if __name__ == "__main__":
    key = jax.random.PRNGKey(0)
    ks = jax.random.split(key, 10)

    params = {
        "embedding": jax.random.normal(ks[0], (VOCAB, EMB), jnp.float32) * 0.5,
        # nn.Linear(2*emb, bow_hidden, bias=False): weight (bow_hidden, 2*emb)
        "w1": jax.random.normal(ks[1], (BOW_HIDDEN, 2 * EMB), jnp.float32) * 0.1,
        # nn.Linear(bow_hidden, 1, bias=False): weight (1, bow_hidden)
        "w2": jax.random.normal(ks[2], (1, BOW_HIDDEN), jnp.float32) * 0.1,
        # nn.GRU(EMB, HIDDEN): gates stored as (3, H, *) in order (r, z, n)
        "w_ih": jax.random.normal(ks[3], (3, HIDDEN, EMB), jnp.float32) * 0.1,
        "w_hh": jax.random.normal(ks[4], (3, HIDDEN, HIDDEN), jnp.float32) * 0.1,
        "b_ih": jax.random.normal(ks[5], (3, HIDDEN), jnp.float32) * 0.1,
        "b_hh": jax.random.normal(ks[6], (3, HIDDEN), jnp.float32) * 0.1,
    }

    document = jax.random.randint(ks[7], (NUM_SENTS, DOC_LEN), 0, VOCAB, jnp.int32)
    question = jax.random.randint(ks[8], (Q_LEN,), 0, VOCAB, jnp.int32)
    # valid-length mask per sentence (each row has at least one valid token)
    lens = jnp.array([8, 6, 4, 7], jnp.int32)
    mask = (jnp.arange(DOC_LEN)[None, :] < lens[:, None]).astype(jnp.float32)

    out = encoder_model_forward(params, document, mask, question)
    out = jax.block_until_ready(out)

    ref = jax.block_until_ready(ref_forward(params, document, mask, question))
    np.testing.assert_allclose(np.asarray(out), np.asarray(ref), rtol=1e-2, atol=1e-2)

    print("KERNEL_OK")
</pallas_src>

<mosaic_0001>
module attributes {stable_mosaic.version = 11 : i64} {
  func.func @encoder_kernel(%arg0: memref<136x128xf32, #tpu.memory_space<vmem>>, %arg1: memref<72x1xf32, #tpu.memory_space<vmem>>, %arg2: memref<1x32xf32, #tpu.memory_space<vmem>>) attributes {dimension_semantics = [], scalar_prefetch = 0 : i64, scratch_operands = 0 : i64, tpu.core_type = #tpu.core_type<tc>} {
    %c0 = arith.constant 0 : index
    %c0_0 = arith.constant 0 : index
    %0 = vector.load %arg0[%c0, %c0_0] : memref<136x128xf32, #tpu.memory_space<vmem>>, vector<50x32xf32>
    %c56 = arith.constant 56 : index
    %c0_1 = arith.constant 0 : index
    %1 = vector.load %arg0[%c56, %c0_1] : memref<136x128xf32, #tpu.memory_space<vmem>>, vector<32x96xf32>
    %c88 = arith.constant 88 : index
    %c0_2 = arith.constant 0 : index
    %2 = vector.load %arg0[%c88, %c0_2] : memref<136x128xf32, #tpu.memory_space<vmem>>, vector<32x96xf32>
    %c120 = arith.constant 120 : index
    %c0_3 = arith.constant 0 : index
    %3 = vector.load %arg0[%c120, %c0_3] : memref<136x128xf32, #tpu.memory_space<vmem>>, vector<1x96xf32>
    %c128 = arith.constant 128 : index
    %c0_4 = arith.constant 0 : index
    %4 = vector.load %arg0[%c128, %c0_4] : memref<136x128xf32, #tpu.memory_space<vmem>>, vector<1x96xf32>
    %c0_5 = arith.constant 0 : index
    %c0_6 = arith.constant 0 : index
    %5 = vector.load %arg1[%c0_5, %c0_6] : memref<72x1xf32, #tpu.memory_space<vmem>>, vector<40x1xf32>
    %c40 = arith.constant 40 : index
    %c0_7 = arith.constant 0 : index
    %6 = vector.load %arg1[%c40, %c0_7] : memref<72x1xf32, #tpu.memory_space<vmem>>, vector<32x1xf32>
    %7 = arith.fptosi %5 : vector<40x1xf32> to vector<40x1xi32>
    %8 = tpu.iota {dimensions = array<i32: 1>} : vector<40x50xi32>
    %9 = vector.broadcast %7 : vector<40x1xi32> to vector<40x50xi32>
    %10 = arith.cmpi eq, %9, %8 : vector<40x50xi32>
    %11 = arith.extui %10 : vector<40x50xi1> to vector<40x50xi32>
    %12 = arith.sitofp %11 : vector<40x50xi32> to vector<40x50xf32>
    %cst = arith.constant dense<0.000000e+00> : vector<40x32xf32>
    %13 = tpu.matmul %12, %0, %cst {dimension_numbers = #tpu.dot_dimension_numbers<[1], [0], [0], [1], [0, 0, 1, 1], [], []>} : vector<40x50xf32>, vector<50x32xf32>, vector<40x32xf32> -> vector<40x32xf32>
    %14 = vector.extract_strided_slice %13 {offsets = [0, 0], sizes = [8, 32], strides = [1, 1]} : vector<40x32xf32> to vector<8x32xf32>
    %15 = vector.extract_strided_slice %13 {offsets = [8, 0], sizes = [32, 32], strides = [1, 1]} : vector<40x32xf32> to vector<32x32xf32>
    %16 = vector.broadcast %6 : vector<32x1xf32> to vector<32x32xf32>
    %17 = arith.mulf %15, %16 : vector<32x32xf32>
    %18 = vector.extract_strided_slice %17 {offsets = [0, 0], sizes = [8, 32], strides = [1, 1]} : vector<32x32xf32> to vector<8x32xf32>
    %19 = vector.extract_strided_slice %17 {offsets = [8, 0], sizes = [8, 32], strides = [1, 1]} : vector<32x32xf32> to vector<8x32xf32>
    %20 = arith.addf %18, %19 : vector<8x32xf32>
    %21 = vector.extract_strided_slice %17 {offsets = [16, 0], sizes = [8, 32], strides = [1, 1]} : vector<32x32xf32> to vector<8x32xf32>
    %22 = arith.addf %20, %21 : vector<8x32xf32>
    %23 = vector.extract_strided_slice %17 {offsets = [24, 0], sizes = [8, 32], strides = [1, 1]} : vector<32x32xf32> to vector<8x32xf32>
    %24 = arith.addf %22, %23 : vector<8x32xf32>
    %25 = arith.truncf %1 : vector<32x96xf32> to vector<32x96xbf16>
    %26 = arith.truncf %14 : vector<8x32xf32> to vector<8x32xbf16>
    %cst_8 = arith.constant dense<0.000000e+00> : vector<8x96xf32>
    %27 = tpu.matmul %26, %25, %cst_8 {dimension_numbers = #tpu.dot_dimension_numbers<[1], [0], [0], [1], [0, 0, 1, 1], [], []>} : vector<8x32xbf16>, vector<32x96xbf16>, vector<8x96xf32> -> vector<8x96xf32>
    %28 = vector.broadcast %3 : vector<1x96xf32> to vector<8x96xf32>
    %29 = arith.addf %27, %28 : vector<8x96xf32>
    %30 = arith.truncf %24 : vector<8x32xf32> to vector<8x32xbf16>
    %cst_9 = arith.constant dense<0.000000e+00> : vector<8x96xf32>
    %31 = tpu.matmul %30, %25, %cst_9 {dimension_numbers = #tpu.dot_dimension_numbers<[1], [0], [0], [1], [0, 0, 1, 1], [], []>} : vector<8x32xbf16>, vector<32x96xbf16>, vector<8x96xf32> -> vector<8x96xf32>
    %32 = vector.broadcast %3 : vector<1x96xf32> to vector<8x96xf32>
    %33 = arith.addf %31, %32 : vector<8x96xf32>
    %34 = arith.truncf %2 : vector<32x96xf32> to vector<32x96xbf16>
    %cst_10 = arith.constant 0.000000e+00 : f32
    %35 = vector.broadcast %cst_10 : f32 to vector<1x32xf32>
    %36 = vector.extract_strided_slice %29 {offsets = [0, 0], sizes = [1, 96], strides = [1, 1]} : vector<8x96xf32> to vector<1x96xf32>
    %37 = arith.truncf %35 : vector<1x32xf32> to vector<1x32xbf16>
    %cst_11 = arith.constant dense<0.000000e+00> : vector<1x96xf32>
    %38 = tpu.matmul %37, %34, %cst_11 {dimension_numbers = #tpu.dot_dimension_numbers<[1], [0], [0], [1], [0, 0, 1, 1], [], []>} : vector<1x32xbf16>, vector<32x96xbf16>, vector<1x96xf32> -> vector<1x96xf32>
    %39 = arith.addf %38, %4 : vector<1x96xf32>
    %40 = vector.extract_strided_slice %36 {offsets = [0, 0], sizes = [1, 64], strides = [1, 1]} : vector<1x96xf32> to vector<1x64xf32>
    %41 = vector.extract_strided_slice %39 {offsets = [0, 0], sizes = [1, 64], strides = [1, 1]} : vector<1x96xf32> to vector<1x64xf32>
    %42 = arith.addf %40, %41 : vector<1x64xf32>
    %43 = arith.negf %42 : vector<1x64xf32>
    %44 = math.exp %43 : vector<1x64xf32>
    %cst_12 = arith.constant 1.000000e+00 : f32
    %45 = vector.broadcast %cst_12 : f32 to vector<1x64xf32>
    %46 = arith.addf %45, %44 : vector<1x64xf32>
    %47 = arith.divf %45, %46 : vector<1x64xf32>
    %48 = vector.extract_strided_slice %47 {offsets = [0, 0], sizes = [1, 32], strides = [1, 1]} : vector<1x64xf32> to vector<1x32xf32>
    %49 = vector.extract_strided_slice %47 {offsets = [0, 32], sizes = [1, 32], strides = [1, 1]} : vector<1x64xf32> to vector<1x32xf32>
    %50 = vector.extract_strided_slice %36 {offsets = [0, 64], sizes = [1, 32], strides = [1, 1]} : vector<1x96xf32> to vector<1x32xf32>
    %51 = vector.extract_strided_slice %39 {offsets = [0, 64], sizes = [1, 32], strides = [1, 1]} : vector<1x96xf32> to vector<1x32xf32>
    %52 = arith.mulf %48, %51 : vector<1x32xf32>
    %53 = arith.addf %50, %52 : vector<1x32xf32>
    %54 = math.tanh %53 : vector<1x32xf32>
    %cst_13 = arith.constant 1.000000e+00 : f32
    %55 = vector.broadcast %cst_13 : f32 to vector<1x32xf32>
    %56 = arith.subf %55, %49 : vector<1x32xf32>
    %57 = arith.mulf %56, %54 : vector<1x32xf32>
    %58 = arith.mulf %49, %35 : vector<1x32xf32>
    %59 = arith.addf %57, %58 : vector<1x32xf32>
    %60 = vector.extract_strided_slice %29 {offsets = [1, 0], sizes = [1, 96], strides = [1, 1]} : vector<8x96xf32> to vector<1x96xf32>
    %61 = arith.truncf %59 : vector<1x32xf32> to vector<1x32xbf16>
    %cst_14 = arith.constant dense<0.000000e+00> : vector<1x96xf32>
    %62 = tpu.matmul %61, %34, %cst_14 {dimension_numbers = #tpu.dot_dimension_numbers<[1], [0], [0], [1], [0, 0, 1, 1], [], []>} : vector<1x32xbf16>, vector<32x96xbf16>, vector<1x96xf32> -> vector<1x96xf32>
    %63 = arith.addf %62, %4 : vector<1x96xf32>
    %64 = vector.extract_strided_slice %60 {offsets = [0, 0], sizes = [1, 64], strides = [1, 1]} : vector<1x96xf32> to vector<1x64xf32>
    %65 = vector.extract_strided_slice %63 {offsets = [0, 0], sizes = [1, 64], strides = [1, 1]} : vector<1x96xf32> to vector<1x64xf32>
    %66 = arith.addf %64, %65 : vector<1x64xf32>
    %67 = arith.negf %66 : vector<1x64xf32>
    %68 = math.exp %67 : vector<1x64xf32>
    %cst_15 = arith.constant 1.000000e+00 : f32
    %69 = vector.broadcast %cst_15 : f32 to vector<1x64xf32>
    %70 = arith.addf %69, %68 : vector<1x64xf32>
    %71 = arith.divf %69, %70 : vector<1x64xf32>
    %72 = vector.extract_strided_slice %71 {offsets = [0, 0], sizes = [1, 32], strides = [1, 1]} : vector<1x64xf32> to vector<1x32xf32>
    %73 = vector.extract_strided_slice %71 {offsets = [0, 32], sizes = [1, 32], strides = [1, 1]} : vector<1x64xf32> to vector<1x32xf32>
    %74 = vector.extract_strided_slice %60 {offsets = [0, 64], sizes = [1, 32], strides = [1, 1]} : vector<1x96xf32> to vector<1x32xf32>
    %75 = vector.extract_strided_slice %63 {offsets = [0, 64], sizes = [1, 32], strides = [1, 1]} : vector<1x96xf32> to vector<1x32xf32>
    %76 = arith.mulf %72, %75 : vector<1x32xf32>
    %77 = arith.addf %74, %76 : vector<1x32xf32>
    %78 = math.tanh %77 : vector<1x32xf32>
    %cst_16 = arith.constant 1.000000e+00 : f32
    %79 = vector.broadcast %cst_16 : f32 to vector<1x32xf32>
    %80 = arith.subf %79, %73 : vector<1x32xf32>
    %81 = arith.mulf %80, %78 : vector<1x32xf32>
    %82 = arith.mulf %73, %59 : vector<1x32xf32>
    %83 = arith.addf %81, %82 : vector<1x32xf32>
    %84 = vector.extract_strided_slice %29 {offsets = [2, 0], sizes = [1, 96], strides = [1, 1]} : vector<8x96xf32> to vector<1x96xf32>
    %85 = arith.truncf %83 : vector<1x32xf32> to vector<1x32xbf16>
    %cst_17 = arith.constant dense<0.000000e+00> : vector<1x96xf32>
    %86 = tpu.matmul %85, %34, %cst_17 {dimension_numbers = #tpu.dot_dimension_numbers<[1], [0], [0], [1], [0, 0, 1, 1], [], []>} : vector<1x32xbf16>, vector<32x96xbf16>, vector<1x96xf32> -> vector<1x96xf32>
    %87 = arith.addf %86, %4 : vector<1x96xf32>
    %88 = vector.extract_strided_slice %84 {offsets = [0, 0], sizes = [1, 64], strides = [1, 1]} : vector<1x96xf32> to vector<1x64xf32>
    %89 = vector.extract_strided_slice %87 {offsets = [0, 0], sizes = [1, 64], strides = [1, 1]} : vector<1x96xf32> to vector<1x64xf32>
    %90 = arith.addf %88, %89 : vector<1x64xf32>
    %91 = arith.negf %90 : vector<1x64xf32>
    %92 = math.exp %91 : vector<1x64xf32>
    %cst_18 = arith.constant 1.000000e+00 : f32
    %93 = vector.broadcast %cst_18 : f32 to vector<1x64xf32>
    %94 = arith.addf %93, %92 : vector<1x64xf32>
    %95 = arith.divf %93, %94 : vector<1x64xf32>
    %96 = vector.extract_strided_slice %95 {offsets = [0, 0], sizes = [1, 32], strides = [1, 1]} : vector<1x64xf32> to vector<1x32xf32>
    %97 = vector.extract_strided_slice %95 {offsets = [0, 32], sizes = [1, 32], strides = [1, 1]} : vector<1x64xf32> to vector<1x32xf32>
    %98 = vector.extract_strided_slice %84 {offsets = [0, 64], sizes = [1, 32], strides = [1, 1]} : vector<1x96xf32> to vector<1x32xf32>
    %99 = vector.extract_strided_slice %87 {offsets = [0, 64], sizes = [1, 32], strides = [1, 1]} : vector<1x96xf32> to vector<1x32xf32>
    %100 = arith.mulf %96, %99 : vector<1x32xf32>
    %101 = arith.addf %98, %100 : vector<1x32xf32>
    %102 = math.tanh %101 : vector<1x32xf32>
    %cst_19 = arith.constant 1.000000e+00 : f32
    %103 = vector.broadcast %cst_19 : f32 to vector<1x32xf32>
    %104 = arith.subf %103, %97 : vector<1x32xf32>
    %105 = arith.mulf %104, %102 : vector<1x32xf32>
    %106 = arith.mulf %97, %83 : vector<1x32xf32>
    %107 = arith.addf %105, %106 : vector<1x32xf32>
    %108 = vector.extract_strided_slice %29 {offsets = [3, 0], sizes = [1, 96], strides = [1, 1]} : vector<8x96xf32> to vector<1x96xf32>
    %109 = arith.truncf %107 : vector<1x32xf32> to vector<1x32xbf16>
    %cst_20 = arith.constant dense<0.000000e+00> : vector<1x96xf32>
    %110 = tpu.matmul %109, %34, %cst_20 {dimension_numbers = #tpu.dot_dimension_numbers<[1], [0], [0], [1], [0, 0, 1, 1], [], []>} : vector<1x32xbf16>, vector<32x96xbf16>, vector<1x96xf32> -> vector<1x96xf32>
    %111 = arith.addf %110, %4 : vector<1x96xf32>
    %112 = vector.extract_strided_slice %108 {offsets = [0, 0], sizes = [1, 64], strides = [1, 1]} : vector<1x96xf32> to vector<1x64xf32>
    %113 = vector.extract_strided_slice %111 {offsets = [0, 0], sizes = [1, 64], strides = [1, 1]} : vector<1x96xf32> to vector<1x64xf32>
    %114 = arith.addf %112, %113 : vector<1x64xf32>
    %115 = arith.negf %114 : vector<1x64xf32>
    %116 = math.exp %115 : vector<1x64xf32>
    %cst_21 = arith.constant 1.000000e+00 : f32
    %117 = vector.broadcast %cst_21 : f32 to vector<1x64xf32>
    %118 = arith.addf %117, %116 : vector<1x64xf32>
    %119 = arith.divf %117, %118 : vector<1x64xf32>
    %120 = vector.extract_strided_slice %119 {offsets = [0, 0], sizes = [1, 32], strides = [1, 1]} : vector<1x64xf32> to vector<1x32xf32>
    %121 = vector.extract_strided_slice %119 {offsets = [0, 32], sizes = [1, 32], strides = [1, 1]} : vector<1x64xf32> to vector<1x32xf32>
    %122 = vector.extract_strided_slice %108 {offsets = [0, 64], sizes = [1, 32], strides = [1, 1]} : vector<1x96xf32> to vector<1x32xf32>
    %123 = vector.extract_strided_slice %111 {offsets = [0, 64], sizes = [1, 32], strides = [1, 1]} : vector<1x96xf32> to vector<1x32xf32>
    %124 = arith.mulf %120, %123 : vector<1x32xf32>
    %125 = arith.addf %122, %124 : vector<1x32xf32>
    %126 = math.tanh %125 : vector<1x32xf32>
    %cst_22 = arith.constant 1.000000e+00 : f32
    %127 = vector.broadcast %cst_22 : f32 to vector<1x32xf32>
    %128 = arith.subf %127, %121 : vector<1x32xf32>
    %129 = arith.mulf %128, %126 : vector<1x32xf32>
    %130 = arith.mulf %121, %107 : vector<1x32xf32>
    %131 = arith.addf %129, %130 : vector<1x32xf32>
    %132 = vector.extract_strided_slice %29 {offsets = [4, 0], sizes = [1, 96], strides = [1, 1]} : vector<8x96xf32> to vector<1x96xf32>
    %133 = arith.truncf %131 : vector<1x32xf32> to vector<1x32xbf16>
    %cst_23 = arith.constant dense<0.000000e+00> : vector<1x96xf32>
    %134 = tpu.matmul %133, %34, %cst_23 {dimension_numbers = #tpu.dot_dimension_numbers<[1], [0], [0], [1], [0, 0, 1, 1], [], []>} : vector<1x32xbf16>, vector<32x96xbf16>, vector<1x96xf32> -> vector<1x96xf32>
    %135 = arith.addf %134, %4 : vector<1x96xf32>
    %136 = vector.extract_strided_slice %132 {offsets = [0, 0], sizes = [1, 64], strides = [1, 1]} : vector<1x96xf32> to vector<1x64xf32>
    %137 = vector.extract_strided_slice %135 {offsets = [0, 0], sizes = [1, 64], strides = [1, 1]} : vector<1x96xf32> to vector<1x64xf32>
    %138 = arith.addf %136, %137 : vector<1x64xf32>
    %139 = arith.negf %138 : vector<1x64xf32>
    %140 = math.exp %139 : vector<1x64xf32>
    %cst_24 = arith.constant 1.000000e+00 : f32
    %141 = vector.broadcast %cst_24 : f32 to vector<1x64xf32>
    %142 = arith.addf %141, %140 : vector<1x64xf32>
    %143 = arith.divf %141, %142 : vector<1x64xf32>
    %144 = vector.extract_strided_slice %143 {offsets = [0, 0], sizes = [1, 32], strides = [1, 1]} : vector<1x64xf32> to vector<1x32xf32>
    %145 = vector.extract_strided_slice %143 {offsets = [0, 32], sizes = [1, 32], strides = [1, 1]} : vector<1x64xf32> to vector<1x32xf32>
    %146 = vector.extract_strided_slice %132 {offsets = [0, 64], sizes = [1, 32], strides = [1, 1]} : vector<1x96xf32> to vector<1x32xf32>
    %147 = vector.extract_strided_slice %135 {offsets = [0, 64], sizes = [1, 32], strides = [1, 1]} : vector<1x96xf32> to vector<1x32xf32>
    %148 = arith.mulf %144, %147 : vector<1x32xf32>
    %149 = arith.addf %146, %148 : vector<1x32xf32>
    %150 = math.tanh %149 : vector<1x32xf32>
    %cst_25 = arith.constant 1.000000e+00 : f32
    %151 = vector.broadcast %cst_25 : f32 to vector<1x32xf32>
    %152 = arith.subf %151, %145 : vector<1x32xf32>
    %153 = arith.mulf %152, %150 : vector<1x32xf32>
    %154 = arith.mulf %145, %131 : vector<1x32xf32>
    %155 = arith.addf %153, %154 : vector<1x32xf32>
    %156 = vector.extract_strided_slice %29 {offsets = [5, 0], sizes = [1, 96], strides = [1, 1]} : vector<8x96xf32> to vector<1x96xf32>
    %157 = arith.truncf %155 : vector<1x32xf32> to vector<1x32xbf16>
    %cst_26 = arith.constant dense<0.000000e+00> : vector<1x96xf32>
    %158 = tpu.matmul %157, %34, %cst_26 {dimension_numbers = #tpu.dot_dimension_numbers<[1], [0], [0], [1], [0, 0, 1, 1], [], []>} : vector<1x32xbf16>, vector<32x96xbf16>, vector<1x96xf32> -> vector<1x96xf32>
    %159 = arith.addf %158, %4 : vector<1x96xf32>
    %160 = vector.extract_strided_slice %156 {offsets = [0, 0], sizes = [1, 64], strides = [1, 1]} : vector<1x96xf32> to vector<1x64xf32>
    %161 = vector.extract_strided_slice %159 {offsets = [0, 0], sizes = [1, 64], strides = [1, 1]} : vector<1x96xf32> to vector<1x64xf32>
    %162 = arith.addf %160, %161 : vector<1x64xf32>
    %163 = arith.negf %162 : vector<1x64xf32>
    %164 = math.exp %163 : vector<1x64xf32>
    %cst_27 = arith.constant 1.000000e+00 : f32
    %165 = vector.broadcast %cst_27 : f32 to vector<1x64xf32>
    %166 = arith.addf %165, %164 : vector<1x64xf32>
    %167 = arith.divf %165, %166 : vector<1x64xf32>
    %168 = vector.extract_strided_slice %167 {offsets = [0, 0], sizes = [1, 32], strides = [1, 1]} : vector<1x64xf32> to vector<1x32xf32>
    %169 = vector.extract_strided_slice %167 {offsets = [0, 32], sizes = [1, 32], strides = [1, 1]} : vector<1x64xf32> to vector<1x32xf32>
    %170 = vector.extract_strided_slice %156 {offsets = [0, 64], sizes = [1, 32], strides = [1, 1]} : vector<1x96xf32> to vector<1x32xf32>
    %171 = vector.extract_strided_slice %159 {offsets = [0, 64], sizes = [1, 32], strides = [1, 1]} : vector<1x96xf32> to vector<1x32xf32>
    %172 = arith.mulf %168, %171 : vector<1x32xf32>
    %173 = arith.addf %170, %172 : vector<1x32xf32>
    %174 = math.tanh %173 : vector<1x32xf32>
    %cst_28 = arith.constant 1.000000e+00 : f32
    %175 = vector.broadcast %cst_28 : f32 to vector<1x32xf32>
    %176 = arith.subf %175, %169 : vector<1x32xf32>
    %177 = arith.mulf %176, %174 : vector<1x32xf32>
    %178 = arith.mulf %169, %155 : vector<1x32xf32>
    %179 = arith.addf %177, %178 : vector<1x32xf32>
    %180 = vector.extract_strided_slice %29 {offsets = [6, 0], sizes = [1, 96], strides = [1, 1]} : vector<8x96xf32> to vector<1x96xf32>
    %181 = arith.truncf %179 : vector<1x32xf32> to vector<1x32xbf16>
    %cst_29 = arith.constant dense<0.000000e+00> : vector<1x96xf32>
    %182 = tpu.matmul %181, %34, %cst_29 {dimension_numbers = #tpu.dot_dimension_numbers<[1], [0], [0], [1], [0, 0, 1, 1], [], []>} : vector<1x32xbf16>, vector<32x96xbf16>, vector<1x96xf32> -> vector<1x96xf32>
    %183 = arith.addf %182, %4 : vector<1x96xf32>
    %184 = vector.extract_strided_slice %180 {offsets = [0, 0], sizes = [1, 64], strides = [1, 1]} : vector<1x96xf32> to vector<1x64xf32>
    %185 = vector.extract_strided_slice %183 {offsets = [0, 0], sizes = [1, 64], strides = [1, 1]} : vector<1x96xf32> to vector<1x64xf32>
    %186 = arith.addf %184, %185 : vector<1x64xf32>
    %187 = arith.negf %186 : vector<1x64xf32>
    %188 = math.exp %187 : vector<1x64xf32>
    %cst_30 = arith.constant 1.000000e+00 : f32
    %189 = vector.broadcast %cst_30 : f32 to vector<1x64xf32>
    %190 = arith.addf %189, %188 : vector<1x64xf32>
    %191 = arith.divf %189, %190 : vector<1x64xf32>
    %192 = vector.extract_strided_slice %191 {offsets = [0, 0], sizes = [1, 32], strides = [1, 1]} : vector<1x64xf32> to vector<1x32xf32>
    %193 = vector.extract_strided_slice %191 {offsets = [0, 32], sizes = [1, 32], strides = [1, 1]} : vector<1x64xf32> to vector<1x32xf32>
    %194 = vector.extract_strided_slice %180 {offsets = [0, 64], sizes = [1, 32], strides = [1, 1]} : vector<1x96xf32> to vector<1x32xf32>
    %195 = vector.extract_strided_slice %183 {offsets = [0, 64], sizes = [1, 32], strides = [1, 1]} : vector<1x96xf32> to vector<1x32xf32>
    %196 = arith.mulf %192, %195 : vector<1x32xf32>
    %197 = arith.addf %194, %196 : vector<1x32xf32>
    %198 = math.tanh %197 : vector<1x32xf32>
    %cst_31 = arith.constant 1.000000e+00 : f32
    %199 = vector.broadcast %cst_31 : f32 to vector<1x32xf32>
    %200 = arith.subf %199, %193 : vector<1x32xf32>
    %201 = arith.mulf %200, %198 : vector<1x32xf32>
    %202 = arith.mulf %193, %179 : vector<1x32xf32>
    %203 = arith.addf %201, %202 : vector<1x32xf32>
    %204 = vector.extract_strided_slice %29 {offsets = [7, 0], sizes = [1, 96], strides = [1, 1]} : vector<8x96xf32> to vector<1x96xf32>
    %205 = arith.truncf %203 : vector<1x32xf32> to vector<1x32xbf16>
    %cst_32 = arith.constant dense<0.000000e+00> : vector<1x96xf32>
    %206 = tpu.matmul %205, %34, %cst_32 {dimension_numbers = #tpu.dot_dimension_numbers<[1], [0], [0], [1], [0, 0, 1, 1], [], []>} : vector<1x32xbf16>, vector<32x96xbf16>, vector<1x96xf32> -> vector<1x96xf32>
    %207 = arith.addf %206, %4 : vector<1x96xf32>
    %208 = vector.extract_strided_slice %204 {offsets = [0, 0], sizes = [1, 64], strides = [1, 1]} : vector<1x96xf32> to vector<1x64xf32>
    %209 = vector.extract_strided_slice %207 {offsets = [0, 0], sizes = [1, 64], strides = [1, 1]} : vector<1x96xf32> to vector<1x64xf32>
    %210 = arith.addf %208, %209 : vector<1x64xf32>
    %211 = arith.negf %210 : vector<1x64xf32>
    %212 = math.exp %211 : vector<1x64xf32>
    %cst_33 = arith.constant 1.000000e+00 : f32
    %213 = vector.broadcast %cst_33 : f32 to vector<1x64xf32>
    %214 = arith.addf %213, %212 : vector<1x64xf32>
    %215 = arith.divf %213, %214 : vector<1x64xf32>
    %216 = vector.extract_strided_slice %215 {offsets = [0, 0], sizes = [1, 32], strides = [1, 1]} : vector<1x64xf32> to vector<1x32xf32>
    %217 = vector.extract_strided_slice %215 {offsets = [0, 32], sizes = [1, 32], strides = [1, 1]} : vector<1x64xf32> to vector<1x32xf32>
    %218 = vector.extract_strided_slice %204 {offsets = [0, 64], sizes = [1, 32], strides = [1, 1]} : vector<1x96xf32> to vector<1x32xf32>
    %219 = vector.extract_strided_slice %207 {offsets = [0, 64], sizes = [1, 32], strides = [1, 1]} : vector<1x96xf32> to vector<1x32xf32>
    %220 = arith.mulf %216, %219 : vector<1x32xf32>
    %221 = arith.addf %218, %220 : vector<1x32xf32>
    %222 = math.tanh %221 : vector<1x32xf32>
    %cst_34 = arith.constant 1.000000e+00 : f32
    %223 = vector.broadcast %cst_34 : f32 to vector<1x32xf32>
    %224 = arith.subf %223, %217 : vector<1x32xf32>
    %225 = arith.mulf %224, %222 : vector<1x32xf32>
    %226 = arith.mulf %217, %203 : vector<1x32xf32>
    %227 = arith.addf %225, %226 : vector<1x32xf32>
    %228 = vector.extract_strided_slice %33 {offsets = [0, 0], sizes = [1, 96], strides = [1, 1]} : vector<8x96xf32> to vector<1x96xf32>
    %229 = arith.truncf %227 : vector<1x32xf32> to vector<1x32xbf16>
    %cst_35 = arith.constant dense<0.000000e+00> : vector<1x96xf32>
    %230 = tpu.matmul %229, %34, %cst_35 {dimension_numbers = #tpu.dot_dimension_numbers<[1], [0], [0], [1], [0, 0, 1, 1], [], []>} : vector<1x32xbf16>, vector<32x96xbf16>, vector<1x96xf32> -> vector<1x96xf32>
    %231 = arith.addf %230, %4 : vector<1x96xf32>
    %232 = vector.extract_strided_slice %228 {offsets = [0, 0], sizes = [1, 64], strides = [1, 1]} : vector<1x96xf32> to vector<1x64xf32>
    %233 = vector.extract_strided_slice %231 {offsets = [0, 0], sizes = [1, 64], strides = [1, 1]} : vector<1x96xf32> to vector<1x64xf32>
    %234 = arith.addf %232, %233 : vector<1x64xf32>
    %235 = arith.negf %234 : vector<1x64xf32>
    %236 = math.exp %235 : vector<1x64xf32>
    %cst_36 = arith.constant 1.000000e+00 : f32
    %237 = vector.broadcast %cst_36 : f32 to vector<1x64xf32>
    %238 = arith.addf %237, %236 : vector<1x64xf32>
    %239 = arith.divf %237, %238 : vector<1x64xf32>
    %240 = vector.extract_strided_slice %239 {offsets = [0, 0], sizes = [1, 32], strides = [1, 1]} : vector<1x64xf32> to vector<1x32xf32>
    %241 = vector.extract_strided_slice %239 {offsets = [0, 32], sizes = [1, 32], strides = [1, 1]} : vector<1x64xf32> to vector<1x32xf32>
    %242 = vector.extract_strided_slice %228 {offsets = [0, 64], sizes = [1, 32], strides = [1, 1]} : vector<1x96xf32> to vector<1x32xf32>
    %243 = vector.extract_strided_slice %231 {offsets = [0, 64], sizes = [1, 32], strides = [1, 1]} : vector<1x96xf32> to vector<1x32xf32>
    %244 = arith.mulf %240, %243 : vector<1x32xf32>
    %245 = arith.addf %242, %244 : vector<1x32xf32>
    %246 = math.tanh %245 : vector<1x32xf32>
    %cst_37 = arith.constant 1.000000e+00 : f32
    %247 = vector.broadcast %cst_37 : f32 to vector<1x32xf32>
    %248 = arith.subf %247, %241 : vector<1x32xf32>
    %249 = arith.mulf %248, %246 : vector<1x32xf32>
    %250 = arith.mulf %241, %227 : vector<1x32xf32>
    %251 = arith.addf %249, %250 : vector<1x32xf32>
    %252 = vector.extract_strided_slice %33 {offsets = [1, 0], sizes = [1, 96], strides = [1, 1]} : vector<8x96xf32> to vector<1x96xf32>
    %253 = arith.truncf %251 : vector<1x32xf32> to vector<1x32xbf16>
    %cst_38 = arith.constant dense<0.000000e+00> : vector<1x96xf32>
    %254 = tpu.matmul %253, %34, %cst_38 {dimension_numbers = #tpu.dot_dimension_numbers<[1], [0], [0], [1], [0, 0, 1, 1], [], []>} : vector<1x32xbf16>, vector<32x96xbf16>, vector<1x96xf32> -> vector<1x96xf32>
    %255 = arith.addf %254, %4 : vector<1x96xf32>
    %256 = vector.extract_strided_slice %252 {offsets = [0, 0], sizes = [1, 64], strides = [1, 1]} : vector<1x96xf32> to vector<1x64xf32>
    %257 = vector.extract_strided_slice %255 {offsets = [0, 0], sizes = [1, 64], strides = [1, 1]} : vector<1x96xf32> to vector<1x64xf32>
    %258 = arith.addf %256, %257 : vector<1x64xf32>
    %259 = arith.negf %258 : vector<1x64xf32>
    %260 = math.exp %259 : vector<1x64xf32>
    %cst_39 = arith.constant 1.000000e+00 : f32
    %261 = vector.broadcast %cst_39 : f32 to vector<1x64xf32>
    %262 = arith.addf %261, %260 : vector<1x64xf32>
    %263 = arith.divf %261, %262 : vector<1x64xf32>
    %264 = vector.extract_strided_slice %263 {offsets = [0, 0], sizes = [1, 32], strides = [1, 1]} : vector<1x64xf32> to vector<1x32xf32>
    %265 = vector.extract_strided_slice %263 {offsets = [0, 32], sizes = [1, 32], strides = [1, 1]} : vector<1x64xf32> to vector<1x32xf32>
    %266 = vector.extract_strided_slice %252 {offsets = [0, 64], sizes = [1, 32], strides = [1, 1]} : vector<1x96xf32> to vector<1x32xf32>
    %267 = vector.extract_strided_slice %255 {offsets = [0, 64], sizes = [1, 32], strides = [1, 1]} : vector<1x96xf32> to vector<1x32xf32>
    %268 = arith.mulf %264, %267 : vector<1x32xf32>
    %269 = arith.addf %266, %268 : vector<1x32xf32>
    %270 = math.tanh %269 : vector<1x32xf32>
    %cst_40 = arith.constant 1.000000e+00 : f32
    %271 = vector.broadcast %cst_40 : f32 to vector<1x32xf32>
    %272 = arith.subf %271, %265 : vector<1x32xf32>
    %273 = arith.mulf %272, %270 : vector<1x32xf32>
    %274 = arith.mulf %265, %251 : vector<1x32xf32>
    %275 = arith.addf %273, %274 : vector<1x32xf32>
    %276 = vector.extract_strided_slice %33 {offsets = [2, 0], sizes = [1, 96], strides = [1, 1]} : vector<8x96xf32> to vector<1x96xf32>
    %277 = arith.truncf %275 : vector<1x32xf32> to vector<1x32xbf16>
    %cst_41 = arith.constant dense<0.000000e+00> : vector<1x96xf32>
    %278 = tpu.matmul %277, %34, %cst_41 {dimension_numbers = #tpu.dot_dimension_numbers<[1], [0], [0], [1], [0, 0, 1, 1], [], []>} : vector<1x32xbf16>, vector<32x96xbf16>, vector<1x96xf32> -> vector<1x96xf32>
    %279 = arith.addf %278, %4 : vector<1x96xf32>
    %280 = vector.extract_strided_slice %276 {offsets = [0, 0], sizes = [1, 64], strides = [1, 1]} : vector<1x96xf32> to vector<1x64xf32>
    %281 = vector.extract_strided_slice %279 {offsets = [0, 0], sizes = [1, 64], strides = [1, 1]} : vector<1x96xf32> to vector<1x64xf32>
    %282 = arith.addf %280, %281 : vector<1x64xf32>
    %283 = arith.negf %282 : vector<1x64xf32>
    %284 = math.exp %283 : vector<1x64xf32>
    %cst_42 = arith.constant 1.000000e+00 : f32
    %285 = vector.broadcast %cst_42 : f32 to vector<1x64xf32>
    %286 = arith.addf %285, %284 : vector<1x64xf32>
    %287 = arith.divf %285, %286 : vector<1x64xf32>
    %288 = vector.extract_strided_slice %287 {offsets = [0, 0], sizes = [1, 32], strides = [1, 1]} : vector<1x64xf32> to vector<1x32xf32>
    %289 = vector.extract_strided_slice %287 {offsets = [0, 32], sizes = [1, 32], strides = [1, 1]} : vector<1x64xf32> to vector<1x32xf32>
    %290 = vector.extract_strided_slice %276 {offsets = [0, 64], sizes = [1, 32], strides = [1, 1]} : vector<1x96xf32> to vector<1x32xf32>
    %291 = vector.extract_strided_slice %279 {offsets = [0, 64], sizes = [1, 32], strides = [1, 1]} : vector<1x96xf32> to vector<1x32xf32>
    %292 = arith.mulf %288, %291 : vector<1x32xf32>
    %293 = arith.addf %290, %292 : vector<1x32xf32>
    %294 = math.tanh %293 : vector<1x32xf32>
    %cst_43 = arith.constant 1.000000e+00 : f32
    %295 = vector.broadcast %cst_43 : f32 to vector<1x32xf32>
    %296 = arith.subf %295, %289 : vector<1x32xf32>
    %297 = arith.mulf %296, %294 : vector<1x32xf32>
    %298 = arith.mulf %289, %275 : vector<1x32xf32>
    %299 = arith.addf %297, %298 : vector<1x32xf32>
    %300 = vector.extract_strided_slice %33 {offsets = [3, 0], sizes = [1, 96], strides = [1, 1]} : vector<8x96xf32> to vector<1x96xf32>
    %301 = arith.truncf %299 : vector<1x32xf32> to vector<1x32xbf16>
    %cst_44 = arith.constant dense<0.000000e+00> : vector<1x96xf32>
    %302 = tpu.matmul %301, %34, %cst_44 {dimension_numbers = #tpu.dot_dimension_numbers<[1], [0], [0], [1], [0, 0, 1, 1], [], []>} : vector<1x32xbf16>, vector<32x96xbf16>, vector<1x96xf32> -> vector<1x96xf32>
    %303 = arith.addf %302, %4 : vector<1x96xf32>
    %304 = vector.extract_strided_slice %300 {offsets = [0, 0], sizes = [1, 64], strides = [1, 1]} : vector<1x96xf32> to vector<1x64xf32>
    %305 = vector.extract_strided_slice %303 {offsets = [0, 0], sizes = [1, 64], strides = [1, 1]} : vector<1x96xf32> to vector<1x64xf32>
    %306 = arith.addf %304, %305 : vector<1x64xf32>
    %307 = arith.negf %306 : vector<1x64xf32>
    %308 = math.exp %307 : vector<1x64xf32>
    %cst_45 = arith.constant 1.000000e+00 : f32
    %309 = vector.broadcast %cst_45 : f32 to vector<1x64xf32>
    %310 = arith.addf %309, %308 : vector<1x64xf32>
    %311 = arith.divf %309, %310 : vector<1x64xf32>
    %312 = vector.extract_strided_slice %311 {offsets = [0, 0], sizes = [1, 32], strides = [1, 1]} : vector<1x64xf32> to vector<1x32xf32>
    %313 = vector.extract_strided_slice %311 {offsets = [0, 32], sizes = [1, 32], strides = [1, 1]} : vector<1x64xf32> to vector<1x32xf32>
    %314 = vector.extract_strided_slice %300 {offsets = [0, 64], sizes = [1, 32], strides = [1, 1]} : vector<1x96xf32> to vector<1x32xf32>
    %315 = vector.extract_strided_slice %303 {offsets = [0, 64], sizes = [1, 32], strides = [1, 1]} : vector<1x96xf32> to vector<1x32xf32>
    %316 = arith.mulf %312, %315 : vector<1x32xf32>
    %317 = arith.addf %314, %316 : vector<1x32xf32>
    %318 = math.tanh %317 : vector<1x32xf32>
    %cst_46 = arith.constant 1.000000e+00 : f32
    %319 = vector.broadcast %cst_46 : f32 to vector<1x32xf32>
    %320 = arith.subf %319, %313 : vector<1x32xf32>
    %321 = arith.mulf %320, %318 : vector<1x32xf32>
    %322 = arith.mulf %313, %299 : vector<1x32xf32>
    %323 = arith.addf %321, %322 : vector<1x32xf32>
    %324 = vector.extract_strided_slice %33 {offsets = [4, 0], sizes = [1, 96], strides = [1, 1]} : vector<8x96xf32> to vector<1x96xf32>
    %325 = arith.truncf %323 : vector<1x32xf32> to vector<1x32xbf16>
    %cst_47 = arith.constant dense<0.000000e+00> : vector<1x96xf32>
    %326 = tpu.matmul %325, %34, %cst_47 {dimension_numbers = #tpu.dot_dimension_numbers<[1], [0], [0], [1], [0, 0, 1, 1], [], []>} : vector<1x32xbf16>, vector<32x96xbf16>, vector<1x96xf32> -> vector<1x96xf32>
    %327 = arith.addf %326, %4 : vector<1x96xf32>
    %328 = vector.extract_strided_slice %324 {offsets = [0, 0], sizes = [1, 64], strides = [1, 1]} : vector<1x96xf32> to vector<1x64xf32>
    %329 = vector.extract_strided_slice %327 {offsets = [0, 0], sizes = [1, 64], strides = [1, 1]} : vector<1x96xf32> to vector<1x64xf32>
    %330 = arith.addf %328, %329 : vector<1x64xf32>
    %331 = arith.negf %330 : vector<1x64xf32>
    %332 = math.exp %331 : vector<1x64xf32>
    %cst_48 = arith.constant 1.000000e+00 : f32
    %333 = vector.broadcast %cst_48 : f32 to vector<1x64xf32>
    %334 = arith.addf %333, %332 : vector<1x64xf32>
    %335 = arith.divf %333, %334 : vector<1x64xf32>
    %336 = vector.extract_strided_slice %335 {offsets = [0, 0], sizes = [1, 32], strides = [1, 1]} : vector<1x64xf32> to vector<1x32xf32>
    %337 = vector.extract_strided_slice %335 {offsets = [0, 32], sizes = [1, 32], strides = [1, 1]} : vector<1x64xf32> to vector<1x32xf32>
    %338 = vector.extract_strided_slice %324 {offsets = [0, 64], sizes = [1, 32], strides = [1, 1]} : vector<1x96xf32> to vector<1x32xf32>
    %339 = vector.extract_strided_slice %327 {offsets = [0, 64], sizes = [1, 32], strides = [1, 1]} : vector<1x96xf32> to vector<1x32xf32>
    %340 = arith.mulf %336, %339 : vector<1x32xf32>
    %341 = arith.addf %338, %340 : vector<1x32xf32>
    %342 = math.tanh %341 : vector<1x32xf32>
    %cst_49 = arith.constant 1.000000e+00 : f32
    %343 = vector.broadcast %cst_49 : f32 to vector<1x32xf32>
    %344 = arith.subf %343, %337 : vector<1x32xf32>
    %345 = arith.mulf %344, %342 : vector<1x32xf32>
    %346 = arith.mulf %337, %323 : vector<1x32xf32>
    %347 = arith.addf %345, %346 : vector<1x32xf32>
    %348 = vector.extract_strided_slice %33 {offsets = [5, 0], sizes = [1, 96], strides = [1, 1]} : vector<8x96xf32> to vector<1x96xf32>
    %349 = arith.truncf %347 : vector<1x32xf32> to vector<1x32xbf16>
    %cst_50 = arith.constant dense<0.000000e+00> : vector<1x96xf32>
    %350 = tpu.matmul %349, %34, %cst_50 {dimension_numbers = #tpu.dot_dimension_numbers<[1], [0], [0], [1], [0, 0, 1, 1], [], []>} : vector<1x32xbf16>, vector<32x96xbf16>, vector<1x96xf32> -> vector<1x96xf32>
    %351 = arith.addf %350, %4 : vector<1x96xf32>
    %352 = vector.extract_strided_slice %348 {offsets = [0, 0], sizes = [1, 64], strides = [1, 1]} : vector<1x96xf32> to vector<1x64xf32>
    %353 = vector.extract_strided_slice %351 {offsets = [0, 0], sizes = [1, 64], strides = [1, 1]} : vector<1x96xf32> to vector<1x64xf32>
    %354 = arith.addf %352, %353 : vector<1x64xf32>
    %355 = arith.negf %354 : vector<1x64xf32>
    %356 = math.exp %355 : vector<1x64xf32>
    %cst_51 = arith.constant 1.000000e+00 : f32
    %357 = vector.broadcast %cst_51 : f32 to vector<1x64xf32>
    %358 = arith.addf %357, %356 : vector<1x64xf32>
    %359 = arith.divf %357, %358 : vector<1x64xf32>
    %360 = vector.extract_strided_slice %359 {offsets = [0, 0], sizes = [1, 32], strides = [1, 1]} : vector<1x64xf32> to vector<1x32xf32>
    %361 = vector.extract_strided_slice %359 {offsets = [0, 32], sizes = [1, 32], strides = [1, 1]} : vector<1x64xf32> to vector<1x32xf32>
    %362 = vector.extract_strided_slice %348 {offsets = [0, 64], sizes = [1, 32], strides = [1, 1]} : vector<1x96xf32> to vector<1x32xf32>
    %363 = vector.extract_strided_slice %351 {offsets = [0, 64], sizes = [1, 32], strides = [1, 1]} : vector<1x96xf32> to vector<1x32xf32>
    %364 = arith.mulf %360, %363 : vector<1x32xf32>
    %365 = arith.addf %362, %364 : vector<1x32xf32>
    %366 = math.tanh %365 : vector<1x32xf32>
    %cst_52 = arith.constant 1.000000e+00 : f32
    %367 = vector.broadcast %cst_52 : f32 to vector<1x32xf32>
    %368 = arith.subf %367, %361 : vector<1x32xf32>
    %369 = arith.mulf %368, %366 : vector<1x32xf32>
    %370 = arith.mulf %361, %347 : vector<1x32xf32>
    %371 = arith.addf %369, %370 : vector<1x32xf32>
    %372 = vector.extract_strided_slice %33 {offsets = [6, 0], sizes = [1, 96], strides = [1, 1]} : vector<8x96xf32> to vector<1x96xf32>
    %373 = arith.truncf %371 : vector<1x32xf32> to vector<1x32xbf16>
    %cst_53 = arith.constant dense<0.000000e+00> : vector<1x96xf32>
    %374 = tpu.matmul %373, %34, %cst_53 {dimension_numbers = #tpu.dot_dimension_numbers<[1], [0], [0], [1], [0, 0, 1, 1], [], []>} : vector<1x32xbf16>, vector<32x96xbf16>, vector<1x96xf32> -> vector<1x96xf32>
    %375 = arith.addf %374, %4 : vector<1x96xf32>
    %376 = vector.extract_strided_slice %372 {offsets = [0, 0], sizes = [1, 64], strides = [1, 1]} : vector<1x96xf32> to vector<1x64xf32>
    %377 = vector.extract_strided_slice %375 {offsets = [0, 0], sizes = [1, 64], strides = [1, 1]} : vector<1x96xf32> to vector<1x64xf32>
    %378 = arith.addf %376, %377 : vector<1x64xf32>
    %379 = arith.negf %378 : vector<1x64xf32>
    %380 = math.exp %379 : vector<1x64xf32>
    %cst_54 = arith.constant 1.000000e+00 : f32
    %381 = vector.broadcast %cst_54 : f32 to vector<1x64xf32>
    %382 = arith.addf %381, %380 : vector<1x64xf32>
    %383 = arith.divf %381, %382 : vector<1x64xf32>
    %384 = vector.extract_strided_slice %383 {offsets = [0, 0], sizes = [1, 32], strides = [1, 1]} : vector<1x64xf32> to vector<1x32xf32>
    %385 = vector.extract_strided_slice %383 {offsets = [0, 32], sizes = [1, 32], strides = [1, 1]} : vector<1x64xf32> to vector<1x32xf32>
    %386 = vector.extract_strided_slice %372 {offsets = [0, 64], sizes = [1, 32], strides = [1, 1]} : vector<1x96xf32> to vector<1x32xf32>
    %387 = vector.extract_strided_slice %375 {offsets = [0, 64], sizes = [1, 32], strides = [1, 1]} : vector<1x96xf32> to vector<1x32xf32>
    %388 = arith.mulf %384, %387 : vector<1x32xf32>
    %389 = arith.addf %386, %388 : vector<1x32xf32>
    %390 = math.tanh %389 : vector<1x32xf32>
    %cst_55 = arith.constant 1.000000e+00 : f32
    %391 = vector.broadcast %cst_55 : f32 to vector<1x32xf32>
    %392 = arith.subf %391, %385 : vector<1x32xf32>
    %393 = arith.mulf %392, %390 : vector<1x32xf32>
    %394 = arith.mulf %385, %371 : vector<1x32xf32>
    %395 = arith.addf %393, %394 : vector<1x32xf32>
    %396 = vector.extract_strided_slice %33 {offsets = [7, 0], sizes = [1, 96], strides = [1, 1]} : vector<8x96xf32> to vector<1x96xf32>
    %397 = arith.truncf %395 : vector<1x32xf32> to vector<1x32xbf16>
    %cst_56 = arith.constant dense<0.000000e+00> : vector<1x96xf32>
    %398 = tpu.matmul %397, %34, %cst_56 {dimension_numbers = #tpu.dot_dimension_numbers<[1], [0], [0], [1], [0, 0, 1, 1], [], []>} : vector<1x32xbf16>, vector<32x96xbf16>, vector<1x96xf32> -> vector<1x96xf32>
    %399 = arith.addf %398, %4 : vector<1x96xf32>
    %400 = vector.extract_strided_slice %396 {offsets = [0, 0], sizes = [1, 64], strides = [1, 1]} : vector<1x96xf32> to vector<1x64xf32>
    %401 = vector.extract_strided_slice %399 {offsets = [0, 0], sizes = [1, 64], strides = [1, 1]} : vector<1x96xf32> to vector<1x64xf32>
    %402 = arith.addf %400, %401 : vector<1x64xf32>
    %403 = arith.negf %402 : vector<1x64xf32>
    %404 = math.exp %403 : vector<1x64xf32>
    %cst_57 = arith.constant 1.000000e+00 : f32
    %405 = vector.broadcast %cst_57 : f32 to vector<1x64xf32>
    %406 = arith.addf %405, %404 : vector<1x64xf32>
    %407 = arith.divf %405, %406 : vector<1x64xf32>
    %408 = vector.extract_strided_slice %407 {offsets = [0, 0], sizes = [1, 32], strides = [1, 1]} : vector<1x64xf32> to vector<1x32xf32>
    %409 = vector.extract_strided_slice %407 {offsets = [0, 32], sizes = [1, 32], strides = [1, 1]} : vector<1x64xf32> to vector<1x32xf32>
    %410 = vector.extract_strided_slice %396 {offsets = [0, 64], sizes = [1, 32], strides = [1, 1]} : vector<1x96xf32> to vector<1x32xf32>
    %411 = vector.extract_strided_slice %399 {offsets = [0, 64], sizes = [1, 32], strides = [1, 1]} : vector<1x96xf32> to vector<1x32xf32>
    %412 = arith.mulf %408, %411 : vector<1x32xf32>
    %413 = arith.addf %410, %412 : vector<1x32xf32>
    %414 = math.tanh %413 : vector<1x32xf32>
    %cst_58 = arith.constant 1.000000e+00 : f32
    %415 = vector.broadcast %cst_58 : f32 to vector<1x32xf32>
    %416 = arith.subf %415, %409 : vector<1x32xf32>
    %417 = arith.mulf %416, %414 : vector<1x32xf32>
    %418 = arith.mulf %409, %395 : vector<1x32xf32>
    %419 = arith.addf %417, %418 : vector<1x32xf32>
    %c0_59 = arith.constant 0 : index
    %c0_60 = arith.constant 0 : index
    %420 = vector.load %arg2[%c0_59, %c0_60] : memref<1x32xf32, #tpu.memory_space<vmem>>, vector<1x32xf32>
    tpu.vector_store %arg2[%c0_59, %c0_60], %419 {strides = array<i32>} : memref<1x32xf32, #tpu.memory_space<vmem>>, vector<1x32xf32>,
    return
  }
}

</mosaic_0001>

<bundles_post_ra>
// kernel: encoder_model_forward.1
= control target key start
LH: loop header
LB: loop body
LE: loop exit
PB: predicated region body
PF: predicated region fallthrough
CT: control target
= control target key end

     0   :  { %vm92_vm0 = vcmask 1041408   ;;  %v2013_v3 = vmov 0   ;;  %v2014_v10 = vmov 0.0   ;;  %vm2015_vm1 = vmmov 0   ;;  %s2390_s0 = inlined_call_operand.vmem [shape: f32[136,128], index: 0, kind: input, shape index: {}]   ;;  %s2391_s1 = inlined_call_operand.vmem [shape: f32[72,1], index: 1, kind: input, shape index: {}]   ;;  %s2392_s2 = inlined_call_operand.hbm [shape: f32[1,32], index: 2, kind: output, shape index: {}]  }
   0x1   :  { %v32_v0 = vld [vmem:[%s2391_s1 + $0x10] sm:$0xff]  ;;  %v30_v1 = vld [vmem:[%s2391_s1] sm:$0xff]  ;;  %v33_v2 = vld [vmem:[%s2391_s1 + $0x18] sm:$0xff]  ;;  %1893 = vset.pattern.permute.xlu1 %v2013_v3  ;;  %1892 = vset.pattern.permute.xlu0 %v2013_v3 }
   0x2   :  { %v1880_v4 = vtrunc.f32 %v32_v0  ;;  %v1876_v5 = vtrunc.f32 %v30_v1  ;;  %v1882_v6 = vtrunc.f32 %v33_v2  ;;  %v31_v7 = vld [vmem:[%s2391_s1 + $0x8] sm:$0xff]  ;;  %v34_v9 = vld [vmem:[%s2391_s1 + $0x20] sm:$0xff]  ;;  %1703 = vmatprep.subr.mxu0 %v2014_v10  ;;  %1717 = vmatprep.mubr.msk.f32.mxu0 %vm2015_vm1, %v2014_v10  ;;  %v19_v13 = vld [vmem:[%s2390_s0 + $0x30] sm:$0x3] }
   0x3   :  { %v1878_v8 = vtrunc.f32 %v31_v7  ;;  %1732 = vmatprep.subr.bf16.mxu1 %v2014_v10  ;;  %1736 = vmatprep.mubr.msk.bf16.mxu1 %vm2015_vm1, %v2014_v10  ;;  %v18_v14 = vld [vmem:[%s2390_s0 + $0x28] sm:$0xff]  ;;  %v1884_v17 = vtrunc.f32 %v34_v9 }
   0x4   :  { %v1881_v11 = vcvt.f32.s32 %v1880_v4  ;;  %v1877_v12 = vcvt.f32.s32 %v1876_v5  ;;  %1704 = vmatpush3.msk.msra.mxu0 %vm92_vm0, %v19_v13  ;;  %v1883_v15 = vcvt.f32.s32 %v1882_v6 }
   0x5   :  { %v1879_v16 = vcvt.f32.s32 %v1878_v8 }
   0x6   :  { %53 = vperm.xlu1 %1893, %v1881_v11   ;;  %47 = vperm.xlu0 %1892, %v1877_v12  }
   0x7   :  { %7 = vsyncpa [#allocation3], 0  ;;  %1705 = vmatprep.subr.mxu0 %v2014_v10  ;;  %v17_v18 = vld [vmem:[%s2390_s0 + $0x20] sm:$0xff]  ;;  %v1885_v19 = vcvt.f32.s32 %v1884_v17  ;;  %v16_v20 = vld [vmem:[%s2390_s0 + $0x18] sm:$0xff]  ;;  %v44_v31 = vlaneseq  ;;  %vm76_vm2 = vcmask 408576   ;;  %vm220_vm8 = vcmask 261120  }
   0x8   :  { %1706 = vmatpush3.msra.mxu0 %v18_v14  ;;  %v35_v21 = vld [vmem:[%s2391_s1 + $0x28] sm:$0xff]  ;;  %v15_v22 = vld [vmem:[%s2390_s0 + $0x10] sm:$0xff]  ;;  %v37_v23 = vld [vmem:[%s2391_s1 + $0x38] sm:$0xff]  ;;  %s2016_s4 = smov 64   ;;  %s2017_s5 = smov 96   ;;  %vm1576_vm9 = vcmask 261127  }
   0x9   :  { %1707 = vmatprep.subr.mxu0 %v2014_v10  ;;  %v36_v24 = vld [vmem:[%s2391_s1 + $0x30] sm:$0xff]  ;;  %v14_v25 = vld [vmem:[%s2390_s0 + $0x8] sm:$0xff]  ;;  %v13_v26 = vld [vmem:[%s2390_s0] sm:$0xff]  ;;  %v45_v32 = vand.u32 127, %v44_v31 }
   0xa   :  { %56 = vperm.xlu1 %1893, %v1883_v15   ;;  %50 = vperm.xlu0 %1892, %v1879_v16   ;;  %v38_v27 = vld [vmem:[%s2391_s1 + $0x40] sm:$0xff]  ;;  %v22_v28 = vld [vmem:[%s2390_s0 + $0x48] sm:$0xff]  ;;  %v23_v29 = vld [vmem:[%s2390_s0 + $0x50] sm:$0xff] }
   0xb   :  { %1708 = vmatpush3.msra.mxu0 %v17_v18  ;;  %v214_v30 = vpack.c.bf16 %v23_v29, %v22_v28  ;;  %v20_v43 = vld [vmem:[%s2390_s0 + $0x38] sm:$0xff]  ;;  %v21_v44 = vld [vmem:[%s2390_s0 + $0x40] sm:$0xff]  ;;  %v26_v46 = vld [vmem:[%s2390_s0 + $0x68] sm:$0xff] }
   0xc   :  { %1709 = vmatprep.subr.mxu0 %v2014_v10  ;;  %v213_v45 = vpack.c.bf16 %v21_v44, %v20_v43  ;;  %v27_v47 = vld [vmem:[%s2390_s0 + $0x70] sm:$0xff]  ;;  %v24_v49 = vld [vmem:[%s2390_s0 + $0x58] sm:$0xff]  ;;  %v25_v50 = vld [vmem:[%s2390_s0 + $0x60] sm:$0xff] }
   0xd   :  { %1710 = vmatpush3.msra.mxu0 %v16_v20  ;;  %1733 = vmatpush3.bf16.msra.mxu1 %v214_v30  ;;  %v2138_v48 = vpack.c.bf16 %v27_v47, %v26_v46  ;;  %v2148_v51 = vpack.c.bf16 %v25_v50, %v24_v49  ;;  %v1603_v17 = vld [vmem:[%s2390_s0 + $0x78] ss:$0 sm:$0xff] }
   0xe   :  { %188 = vperm.xlu1 %1893, %v35_v21   ;;  %59 = vperm.xlu0 %1892, %v1885_v19  }
   0xf   :  { %1711 = vmatprep.subr.mxu0 %v2014_v10  ;;  %1734 = vmatprep.subr.bf16.mxu1 %v2014_v10 }
  0x10   :  { %1712 = vmatpush3.msra.mxu0 %v15_v22  ;;  %v2179_v22 = vld [vmem:[%s2390_s0 + $0x80] sm:$0x1] }
  0x11   :  { %1713 = vmatprep.subr.mxu0 %v2014_v10  ;;  %1735 = vmatpush3.bf16.msra.mxu1 %v213_v45 }
  0x12   :  { %198 = vperm.xlu1 %1893, %v37_v23   ;;  %193 = vperm.xlu0 %1892, %v36_v24  }
  0x13   :  { %1714 = vmatpush3.msra.mxu0 %v14_v25  ;;  %1740 = vmatprep.subr.bf16.mxu1 %v2014_v10 }
  0x14   :  { %1715 = vmatprep.subr.mxu0 %v2014_v10 }
  0x15   :  { %1716 = vmatpush3.msra.mxu0 %v13_v26 }
  0x16   :  { %203 = vperm.xlu0 %1892, %v38_v27   ;;  %1764 = vmatprep.subr.bf16.mxu0 %v2014_v10 }
  0x81   :  { %v48_v33 = vpop.permute.xlu0 %47  ;;  %v54_v35 = vpop.permute.xlu1 %53 }
  0x82   :  { %vm61_vm3 = vcmp.eq.s32.totalorder %v48_v33, %v45_v32  ;;  %vm63_vm4 = vcmp.eq.s32.totalorder %v54_v35, %v45_v32 }
  0x83   :  { %v1592_v34 = vsel %vm61_vm3, 1.0, %v2014_v10  ;;  %v1594_v38 = vsel %vm63_vm4, 1.0, %v2014_v10 }
  0x84   :  { %1718 = vmatmul.mubr.msk.f32.vlgmr.msra.gmra.mxu0 %vm76_vm2, %v1592_v34 }
  0x85   :  { %v51_v36 = vpop.permute.xlu0 %50  ;;  %1720 = vmatprep.mubr.msk.f32.mxu0 %vm2015_vm1, %v2014_v10  ;;  %v57_v39 = vpop.permute.xlu1 %56  ;;  %1765 = vmatpush3.bf16.msra.mxu0 %v2138_v48 }
  0x86   :  { %vm62_vm5 = vcmp.eq.s32.totalorder %v51_v36, %v45_v32  ;;  %vm64_vm6 = vcmp.eq.s32.totalorder %v57_v39, %v45_v32  ;;  %1766 = vmatprep.subr.bf16.mxu0 %v2014_v10 }
  0x87   :  { %v1593_v37 = vsel %vm62_vm5, 1.0, %v2014_v10  ;;  %v1595_v41 = vsel %vm64_vm6, 1.0, %v2014_v10 }
  0x88   :  { %1721 = vmatmul.mubr.msk.f32.gmra.mxu0 %vm76_vm2, %v1593_v37 }
  0x89   :  { %1723 = vmatprep.mubr.msk.f32.mxu0 %vm2015_vm1, %v2014_v10  ;;  %v60_v40 = vpop.permute.xlu0 %59  ;;  %1767 = vmatpush3.bf16.msra.mxu0 %v2148_v51  ;;  %v189_v56 = vpop.permute.xlu1 %188 }
  0x8a   :  { %vm65_vm7 = vcmp.eq.s32.totalorder %v60_v40, %v45_v32  ;;  %1780 = vmatprep.subr.bf16.mxu0 %v2014_v10 }
  0x8b   :  { %v1596_v42 = vsel %vm65_vm7, 1.0, %v2014_v10 }
  0x8c   :  { %1724 = vmatmul.mubr.msk.f32.gmra.mxu0 %vm76_vm2, %v1594_v38 }
  0x8d   :  { %1726 = vmatprep.mubr.msk.f32.mxu0 %vm2015_vm1, %v2014_v10  ;;  %v194_v59 = vpop.permute.xlu0 %193  ;;  %v199_v62 = vpop.permute.xlu1 %198 }
  0x90   :  { %1727 = vmatmul.mubr.msk.f32.gmra.mxu0 %vm76_vm2, %v1595_v41 }
  0x91   :  { %1729 = vmatprep.mubr.msk.f32.mxu0 %vm2015_vm1, %v2014_v10  ;;  %v204_v5 = vpop.permute.xlu0 %203 }
  0x94   :  { %1730 = vmatmul.mubr.msk.f32.gmra.mxu0 %vm76_vm2, %v1596_v42 }
  0x95   :  { %1768 = vmatprep.mubr.msk.bf16.mxu0 %vm2015_vm1, %v2014_v10 }
 0x144   :  { %v162_v52 = vpop.f32.mrf.mxu0 }
 0x145   :  { %v215_v53 = vpack.c.bf16 %v162_v52, %v162_v52 }
 0x146   :  { %v1719_v54 = vpop.f32.mrf.mxu0 }
 0x147   :  { %1737 = vmatmul.mubr.msk.bf16.vlgmr.msra.gmra.mxu1 %vm220_vm8, %v215_v53 }
 0x148   :  { %v167_v55 = vpop.f32.mrf.mxu0  ;;  %1741 = vmatpush3.bf16.msra.mxu1 %v214_v30  ;;  %1744 = vmatprep.mubr.msk.bf16.mxu1 %vm2015_vm1, %v2014_v10 }
 0x149   :  { %1742 = vmatprep.subr.bf16.mxu1 %v2014_v10  ;;  %v206_v0 = vmul.f32 %v189_v56, %v167_v55 }
 0x14a   :  { %v1722_v57 = vpop.f32.mrf.mxu0 }
 0x14c   :  { %v172_v58 = vpop.f32.mrf.mxu0  ;;  %1743 = vmatpush3.bf16.msra.mxu1 %v213_v45 }
 0x14d   :  { %1748 = vmatprep.subr.bf16.mxu1 %v2014_v10  ;;  %v207_v61 = vmul.f32 %v194_v59, %v172_v58 }
 0x14e   :  { %v1725_v60 = vpop.f32.mrf.mxu0 }
 0x14f   :  { %v210_v4 = vadd.f32 %v207_v61, %v206_v0 }
 0x150   :  { %v177_v63 = vpop.f32.mrf.mxu0 }
 0x151   :  { %v208_v1 = vmul.f32 %v199_v62, %v177_v63 }
 0x152   :  { %v1728_v2 = vpop.f32.mrf.mxu0 }
 0x153   :  { %v211_v7 = vadd.f32 %v210_v4, %v208_v1 }
 0x154   :  { %v182_v6 = vpop.f32.mrf.mxu0 }
 0x155   :  { %v209_v8 = vmul.f32 %v204_v5, %v182_v6 }
 0x156   :  { %v1731_v9 = vpop.f32.mrf.mxu0 }
 0x157   :  { %v212_v11 = vadd.f32 %v211_v7, %v209_v8 }
 0x159   :  { %v264_v12 = vpack.c.bf16 %v212_v11, %v212_v11 }
 0x15b   :  { %1745 = vmatmul.mubr.msk.bf16.vlgmr.msra.gmra.mxu1 %vm220_vm8, %v264_v12 }
 0x15c   :  { %1749 = vmatpush3.bf16.msra.mxu1 %v2138_v48  ;;  %1752 = vmatprep.mubr.msk.bf16.mxu1 %vm2015_vm1, %v2014_v10 }
 0x15d   :  { %1750 = vmatprep.subr.bf16.mxu1 %v2014_v10 }
 0x160   :  { %1751 = vmatpush3.bf16.msra.mxu1 %v2148_v51 }
 0x161   :  { %1756 = vmatprep.subr.bf16.mxu1 %v2014_v10 }
 0x163   :  { %1753 = vmatmul.mubr.bf16.vlgmr.msra.gmra.mxu1 %v2013_v3 }
 0x164   :  { %1757 = vmatpush3.bf16.msra.mxu1 %v2138_v48  ;;  %1760 = vmatprep.mubr.msk.bf16.mxu1 %vm2015_vm1, %v2014_v10 }
 0x165   :  { %1758 = vmatprep.subr.bf16.mxu1 %v2014_v10 }
 0x168   :  { %1759 = vmatpush3.bf16.msra.mxu1 %v2148_v51 }
 0x169   :  { %1772 = vmatprep.subr.bf16.mxu1 %v2014_v10 }
 0x207   :  { %v258_v13 = vpop.f32.mrf.mxu1 }
 0x208   :  { %v2183_v28 = vadd.f32 %v1603_v17, %v258_v13 }
 0x209   :  { %v1738_v14 = vpop.f32.mrf.mxu1 }
 0x20b   :  { %v261_v15 = vpop.f32.mrf.mxu1 }
 0x20d   :  { %v1739_v16 = vpop.f32.mrf.mxu1 }
 0x21b   :  { %v302_v3 = vpop.f32.mrf.mxu1 }
 0x21c   :  { %v2174_v18 = vadd.f32 %v1603_v17, %v302_v3 }
 0x21d   :  { %v1746_v19 = vpop.f32.mrf.mxu1 }
 0x21f   :  { %v305_v20 = vpop.f32.mrf.mxu1 }
 0x221   :  { %v1747_v21 = vpop.f32.mrf.mxu1 }
 0x223   :  { %v347_v23 = vpop.f32.mrf.mxu1 }
 0x224   :  { %v348_v24 = vadd.f32 %v347_v23, %v2179_v22 }
 0x225   :  { %v1754_v25 = vpop.f32.mrf.mxu1 }
 0x226   :  { %361 = vrot.lane.b32.xlu1 %v348_v24, %s2016_s4  ;;  %v353_v29 = vadd.f32 %v348_v24, %v2183_v28 }
 0x227   :  { %v350_v26 = vpop.f32.mrf.mxu1 }
 0x228   :  { %v1606_v30 = vmul.f32 -1.442695, %v353_v29 }
 0x229   :  { %v1755_v27 = vpop.f32.mrf.mxu1 }
 0x22a   :  { %1894 = vpow2.f32 %v1606_v30 }
 0x237   :  { %v1895_v31 = vpop.eup %1894 }
 0x238   :  { %v357_v32 = vadd.f32 1.0, %v1895_v31 }
 0x23a   :  { %1896 = vrcp.f32 %v357_v32 }
 0x247   :  { %v1897_v33 = vpop.eup %1896 }
 0x248   :  { %v371_v39 = vsub.f32 1.0, %v1897_v33  ;;  %v377_v41 = vmul.f32 0.0, %v1897_v33 }
 0x298   :  { %v362_v34 = vpop.permute.xlu1 %361 }
 0x299   :  { %v364_v35 = vmul.f32 %v1897_v33, %v362_v34 }
 0x29b   :  { %366 = vrot.lane.b32.xlu0 %v364_v35, %s2016_s4 }
 0x30d   :  { %v367_v36 = vpop.permute.xlu0 %366 }
 0x30e   :  { %v369_v37 = vadd.f32 %v367_v36, %v2183_v28 }
 0x310   :  { %1898 = vtanh.f32 %v369_v37 }
 0x31d   :  { %v1899_v38 = vpop.eup %1898 }
 0x31e   :  { %373 = vrot.lane.b32.xlu1 %v1899_v38, %s2017_s5 }
 0x390   :  { %v374_v40 = vpop.permute.xlu1 %373 }
 0x391   :  { %v376_v42 = vmul.f32 %v374_v40, %v371_v39 }
 0x393   :  { %v378_v43 = vadd.f32 %v377_v41, %v376_v42 }
 0x395   :  { %v379_v44 = vpack.c.bf16 %v378_v43, %v378_v43  ;;  %v453_v0 = vrot.slane %v378_v43, 7 }
 0x397   :  { %381 = vrot.lane.b32.xlu0 %v379_v44, %s2017_s5 }
 0x409   :  { %v382_v45 = vpop.permute.xlu0 %381 }
 0x40a   :  { %1761 = vmatmul.mubr.msk.bf16.vlgmr.msra.gmra.mxu1 %vm220_vm8, %v382_v45 }
 0x40b   :  { %1773 = vmatpush3.bf16.msra.mxu1 %v2138_v48  ;;  %1776 = vmatprep.mubr.msk.bf16.mxu1 %vm2015_vm1, %v2014_v10 }
 0x40c   :  { %1774 = vmatprep.subr.bf16.mxu1 %v2014_v10 }
 0x40f   :  { %1775 = vmatpush3.bf16.msra.mxu1 %v2148_v51 }
 0x410   :  { %1788 = vmatprep.subr.bf16.mxu1 %v2014_v10 }
 0x4ca   :  { %v420_v46 = vpop.f32.mrf.mxu1 }
 0x4cb   :  { %v421_v47 = vadd.f32 %v420_v46, %v2179_v22 }
 0x4cc   :  { %v1762_v49 = vpop.f32.mrf.mxu1 }
 0x4cd   :  { %v427_v50 = vrot.slane %v421_v47, 7 }
 0x4ce   :  { %v423_v52 = vpop.f32.mrf.mxu1 }
 0x4cf   :  { %436 = vrot.lane.b32.xlu1 %v427_v50, %s2016_s4  ;;  %v429_v54 = vadd.f32 %v427_v50, %v2183_v28 }
 0x4d0   :  { %v1763_v53 = vpop.f32.mrf.mxu1 }
 0x4d1   :  { %v1608_v55 = vmul.f32 -1.442695, %v429_v54 }
 0x4d3   :  { %1900 = vpow2.f32 %v1608_v55 }
 0x4e0   :  { %v1901_v56 = vpop.eup %1900 }
 0x4e1   :  { %v433_v57 = vadd.f32 1.0, %v1901_v56 }
 0x4e3   :  { %1902 = vrcp.f32 %v433_v57 }
 0x4f0   :  { %v1903_v58 = vpop.eup %1902 }
 0x4f1   :  { %v446_v1 = vsub.f32 1.0, %v1903_v58  ;;  %v455_v4 = vmul.f32 %v1903_v58, %v453_v0 }
 0x541   :  { %v437_v59 = vpop.permute.xlu1 %436 }
 0x542   :  { %v439_v60 = vmul.f32 %v1903_v58, %v437_v59 }
 0x544   :  { %441 = vrot.lane.b32.xlu0 %v439_v60, %s2016_s4 }
 0x5b6   :  { %v442_v61 = vpop.permute.xlu0 %441 }
 0x5b7   :  { %v444_v62 = vadd.f32 %v442_v61, %v2183_v28 }
 0x5b9   :  { %1904 = vtanh.f32 %v444_v62 }
 0x5c6   :  { %v1905_v63 = vpop.eup %1904 }
 0x5c7   :  { %448 = vrot.lane.b32.xlu1 %v1905_v63, %s2017_s5 }
 0x639   :  { %v449_v2 = vpop.permute.xlu1 %448 }
 0x63a   :  { %v451_v5 = vmul.f32 %v449_v2, %v446_v1 }
 0x63c   :  { %v456_v6 = vadd.f32 %v455_v4, %v451_v5 }
 0x63e   :  { %v457_v7 = vpack.c.bf16 %v456_v6, %v456_v6  ;;  %v533_v29 = vrot.slane %v456_v6, 7 }
 0x640   :  { %v459_v8 = vshrl.u32 %v457_v7, 16 }
 0x642   :  { %461 = vrot.lane.b32.xlu0 %v459_v8, %s2017_s5 }
 0x6b4   :  { %v462_v9 = vpop.permute.xlu0 %461 }
 0x6b5   :  { %1769 = vmatmul.mubr.msk.bf16.vlgmr.msra.gmra.mxu0 %vm220_vm8, %v462_v9 }
 0x6b6   :  { %1781 = vmatpush3.bf16.msra.mxu0 %v2138_v48  ;;  %1784 = vmatprep.mubr.msk.bf16.mxu0 %vm2015_vm1, %v2014_v10 }
 0x6b7   :  { %1782 = vmatprep.subr.bf16.mxu0 %v2014_v10 }
 0x6ba   :  { %1783 = vmatpush3.bf16.msra.mxu0 %v2148_v51 }
 0x6bb   :  { %1796 = vmatprep.subr.bf16.mxu0 %v2014_v10 }
 0x775   :  { %v500_v11 = vpop.f32.mrf.mxu0 }
 0x776   :  { %v501_v12 = vadd.f32 %v500_v11, %v2179_v22 }
 0x777   :  { %v1770_v13 = vpop.f32.mrf.mxu0 }
 0x778   :  { %v507_v14 = vrot.slane %v501_v12, 6 }
 0x779   :  { %v503_v15 = vpop.f32.mrf.mxu0 }
 0x77a   :  { %516 = vrot.lane.b32.xlu1 %v507_v14, %s2016_s4  ;;  %v509_v17 = vadd.f32 %v507_v14, %v2183_v28 }
 0x77b   :  { %v1771_v16 = vpop.f32.mrf.mxu0 }
 0x77c   :  { %v1610_v3 = vmul.f32 -1.442695, %v509_v17 }
 0x77e   :  { %1906 = vpow2.f32 %v1610_v3 }
 0x78b   :  { %v1907_v19 = vpop.eup %1906 }
 0x78c   :  { %v513_v20 = vadd.f32 1.0, %v1907_v19 }
 0x78e   :  { %1908 = vrcp.f32 %v513_v20 }
 0x79b   :  { %v1909_v21 = vpop.eup %1908 }
 0x79c   :  { %v526_v30 = vsub.f32 1.0, %v1909_v21  ;;  %v535_v32 = vmul.f32 %v1909_v21, %v533_v29 }
 0x7ec   :  { %v517_v23 = vpop.permute.xlu1 %516 }
 0x7ed   :  { %v519_v24 = vmul.f32 %v1909_v21, %v517_v23 }
 0x7ef   :  { %521 = vrot.lane.b32.xlu0 %v519_v24, %s2016_s4 }
 0x861   :  { %v522_v25 = vpop.permute.xlu0 %521 }
 0x862   :  { %v524_v26 = vadd.f32 %v522_v25, %v2183_v28 }
 0x864   :  { %1910 = vtanh.f32 %v524_v26 }
 0x871   :  { %v1911_v27 = vpop.eup %1910 }
 0x872   :  { %528 = vrot.lane.b32.xlu1 %v1911_v27, %s2017_s5 }
 0x8e4   :  { %v529_v31 = vpop.permute.xlu1 %528 }
 0x8e5   :  { %v531_v33 = vmul.f32 %v529_v31, %v526_v30 }
 0x8e7   :  { %v536_v34 = vadd.f32 %v535_v32, %v531_v33 }
 0x8e9   :  { %v537_v35 = vpack.c.bf16 %v536_v34, %v536_v34  ;;  %v612_v56 = vrot.slane %v536_v34, 7 }
 0x8eb   :  { %v539_v36 = vrot.slane %v537_v35, 1 }
 0x8ed   :  { %540 = vrot.lane.b32.xlu0 %v539_v36, %s2017_s5 }
 0x95f   :  { %v541_v37 = vpop.permute.xlu0 %540 }
 0x960   :  { %1777 = vmatmul.mubr.msk.bf16.vlgmr.msra.gmra.mxu1 %vm220_vm8, %v541_v37 }
 0x961   :  { %1789 = vmatpush3.bf16.msra.mxu1 %v2138_v48  ;;  %1792 = vmatprep.mubr.msk.bf16.mxu1 %vm2015_vm1, %v2014_v10 }
 0x962   :  { %1790 = vmatprep.subr.bf16.mxu1 %v2014_v10 }
 0x965   :  { %1791 = vmatpush3.bf16.msra.mxu1 %v2148_v51 }
 0x966   :  { %1804 = vmatprep.subr.bf16.mxu1 %v2014_v10 }
 0xa20   :  { %v579_v38 = vpop.f32.mrf.mxu1 }
 0xa21   :  { %v580_v39 = vadd.f32 %v579_v38, %v2179_v22 }
 0xa22   :  { %v1778_v40 = vpop.f32.mrf.mxu1 }
 0xa23   :  { %v586_v41 = vrot.slane %v580_v39, 5 }
 0xa24   :  { %v582_v42 = vpop.f32.mrf.mxu1 }
 0xa25   :  { %595 = vrot.lane.b32.xlu1 %v586_v41, %s2016_s4  ;;  %v588_v44 = vadd.f32 %v586_v41, %v2183_v28 }
 0xa26   :  { %v1779_v43 = vpop.f32.mrf.mxu1 }
 0xa27   :  { %v1612_v45 = vmul.f32 -1.442695, %v588_v44 }
 0xa29   :  { %1912 = vpow2.f32 %v1612_v45 }
 0xa36   :  { %v1913_v46 = vpop.eup %1912 }
 0xa37   :  { %v592_v47 = vadd.f32 1.0, %v1913_v46 }
 0xa39   :  { %1914 = vrcp.f32 %v592_v47 }
 0xa46   :  { %v1915_v49 = vpop.eup %1914 }
 0xa47   :  { %v605_v57 = vsub.f32 1.0, %v1915_v49  ;;  %v614_v59 = vmul.f32 %v1915_v49, %v612_v56 }
 0xa97   :  { %v596_v50 = vpop.permute.xlu1 %595 }
 0xa98   :  { %v598_v52 = vmul.f32 %v1915_v49, %v596_v50 }
 0xa9a   :  { %600 = vrot.lane.b32.xlu0 %v598_v52, %s2016_s4 }
 0xb0c   :  { %v601_v53 = vpop.permute.xlu0 %600 }
 0xb0d   :  { %v603_v54 = vadd.f32 %v601_v53, %v2183_v28 }
 0xb0f   :  { %1916 = vtanh.f32 %v603_v54 }
 0xb1c   :  { %v1917_v55 = vpop.eup %1916 }
 0xb1d   :  { %607 = vrot.lane.b32.xlu1 %v1917_v55, %s2017_s5 }
 0xb8f   :  { %v608_v58 = vpop.permute.xlu1 %607 }
 0xb90   :  { %v610_v60 = vmul.f32 %v608_v58, %v605_v57 }
 0xb92   :  { %v615_v61 = vadd.f32 %v614_v59, %v610_v60 }
 0xb94   :  { %v616_v62 = vpack.c.bf16 %v615_v61, %v615_v61  ;;  %v693_v20 = vrot.slane %v615_v61, 7 }
 0xb96   :  { %v618_v63 = vshrl.u32 %v616_v62, 16 }
 0xb98   :  { %v620_v0 = vrot.slane %v618_v63, 1 }
 0xb9a   :  { %621 = vrot.lane.b32.xlu0 %v620_v0, %s2017_s5 }
 0xc0c   :  { %v622_v1 = vpop.permute.xlu0 %621 }
 0xc0d   :  { %1785 = vmatmul.mubr.msk.bf16.vlgmr.msra.gmra.mxu0 %vm220_vm8, %v622_v1 }
 0xc0e   :  { %1797 = vmatpush3.bf16.msra.mxu0 %v2138_v48  ;;  %1800 = vmatprep.mubr.msk.bf16.mxu0 %vm2015_vm1, %v2014_v10 }
 0xc0f   :  { %1798 = vmatprep.subr.bf16.mxu0 %v2014_v10 }
 0xc12   :  { %1799 = vmatpush3.bf16.msra.mxu0 %v2148_v51 }
 0xc13   :  { %1812 = vmatprep.subr.bf16.mxu0 %v2014_v10 }
 0xccd   :  { %v660_v2 = vpop.f32.mrf.mxu0 }
 0xcce   :  { %v661_v4 = vadd.f32 %v660_v2, %v2179_v22 }
 0xccf   :  { %v1786_v5 = vpop.f32.mrf.mxu0 }
 0xcd0   :  { %v667_v6 = vrot.slane %v661_v4, 4 }
 0xcd1   :  { %v663_v7 = vpop.f32.mrf.mxu0 }
 0xcd2   :  { %676 = vrot.lane.b32.xlu1 %v667_v6, %s2016_s4  ;;  %v669_v9 = vadd.f32 %v667_v6, %v2183_v28 }
 0xcd3   :  { %v1787_v8 = vpop.f32.mrf.mxu0 }
 0xcd4   :  { %v1614_v11 = vmul.f32 -1.442695, %v669_v9 }
 0xcd6   :  { %1918 = vpow2.f32 %v1614_v11 }
 0xce3   :  { %v1919_v12 = vpop.eup %1918 }
 0xce4   :  { %v673_v13 = vadd.f32 1.0, %v1919_v12 }
 0xce6   :  { %1920 = vrcp.f32 %v673_v13 }
 0xcf3   :  { %v1921_v14 = vpop.eup %1920 }
 0xcf4   :  { %v686_v21 = vsub.f32 1.0, %v1921_v14  ;;  %v695_v24 = vmul.f32 %v1921_v14, %v693_v20 }
 0xd44   :  { %v677_v15 = vpop.permute.xlu1 %676 }
 0xd45   :  { %v679_v16 = vmul.f32 %v1921_v14, %v677_v15 }
 0xd47   :  { %681 = vrot.lane.b32.xlu0 %v679_v16, %s2016_s4 }
 0xdb9   :  { %v682_v17 = vpop.permute.xlu0 %681 }
 0xdba   :  { %v684_v3 = vadd.f32 %v682_v17, %v2183_v28 }
 0xdbc   :  { %1922 = vtanh.f32 %v684_v3 }
 0xdc9   :  { %v1923_v19 = vpop.eup %1922 }
 0xdca   :  { %688 = vrot.lane.b32.xlu1 %v1923_v19, %s2017_s5 }
 0xe3c   :  { %v689_v23 = vpop.permute.xlu1 %688 }
 0xe3d   :  { %v691_v25 = vmul.f32 %v689_v23, %v686_v21 }
 0xe3f   :  { %v696_v26 = vadd.f32 %v695_v24, %v691_v25 }
 0xe41   :  { %v697_v27 = vpack.c.bf16 %v696_v26, %v696_v26  ;;  %v772_v47 = vrot.slane %v696_v26, 7 }
 0xe43   :  { %v699_v29 = vrot.slane %v697_v27, 2 }
 0xe45   :  { %700 = vrot.lane.b32.xlu0 %v699_v29, %s2017_s5 }
 0xeb7   :  { %v701_v30 = vpop.permute.xlu0 %700 }
 0xeb8   :  { %1793 = vmatmul.mubr.msk.bf16.vlgmr.msra.gmra.mxu1 %vm220_vm8, %v701_v30 }
 0xeb9   :  { %1805 = vmatpush3.bf16.msra.mxu1 %v2138_v48  ;;  %1808 = vmatprep.mubr.msk.bf16.mxu1 %vm2015_vm1, %v2014_v10 }
 0xeba   :  { %1806 = vmatprep.subr.bf16.mxu1 %v2014_v10 }
 0xebd   :  { %1807 = vmatpush3.bf16.msra.mxu1 %v2148_v51 }
 0xebe   :  { %1820 = vmatprep.subr.bf16.mxu1 %v2014_v10 }
 0xf78   :  { %v739_v31 = vpop.f32.mrf.mxu1 }
 0xf79   :  { %v740_v32 = vadd.f32 %v739_v31, %v2179_v22 }
 0xf7a   :  { %v1794_v33 = vpop.f32.mrf.mxu1 }
 0xf7b   :  { %v746_v34 = vrot.slane %v740_v32, 3 }
 0xf7c   :  { %v742_v35 = vpop.f32.mrf.mxu1 }
 0xf7d   :  { %755 = vrot.lane.b32.xlu1 %v746_v34, %s2016_s4  ;;  %v748_v37 = vadd.f32 %v746_v34, %v2183_v28 }
 0xf7e   :  { %v1795_v36 = vpop.f32.mrf.mxu1 }
 0xf7f   :  { %v1616_v38 = vmul.f32 -1.442695, %v748_v37 }
 0xf81   :  { %1924 = vpow2.f32 %v1616_v38 }
 0xf8e   :  { %v1925_v39 = vpop.eup %1924 }
 0xf8f   :  { %v752_v40 = vadd.f32 1.0, %v1925_v39 }
 0xf91   :  { %1926 = vrcp.f32 %v752_v40 }
 0xf9e   :  { %v1927_v41 = vpop.eup %1926 }
 0xf9f   :  { %v765_v49 = vsub.f32 1.0, %v1927_v41  ;;  %v774_v52 = vmul.f32 %v1927_v41, %v772_v47 }
 0xfef   :  { %v756_v42 = vpop.permute.xlu1 %755 }
 0xff0   :  { %v758_v43 = vmul.f32 %v1927_v41, %v756_v42 }
 0xff2   :  { %760 = vrot.lane.b32.xlu0 %v758_v43, %s2016_s4 }
0x1064   :  { %v761_v44 = vpop.permute.xlu0 %760 }
0x1065   :  { %v763_v45 = vadd.f32 %v761_v44, %v2183_v28 }
0x1067   :  { %1928 = vtanh.f32 %v763_v45 }
0x1074   :  { %v1929_v46 = vpop.eup %1928 }
0x1075   :  { %767 = vrot.lane.b32.xlu1 %v1929_v46, %s2017_s5 }
0x10e7   :  { %v768_v50 = vpop.permute.xlu1 %767 }
0x10e8   :  { %v770_v53 = vmul.f32 %v768_v50, %v765_v49 }
0x10ea   :  { %v775_v54 = vadd.f32 %v774_v52, %v770_v53 }
0x10ec   :  { %v776_v55 = vpack.c.bf16 %v775_v54, %v775_v54  ;;  %v853_v13 = vrot.slane %v775_v54, 7 }
0x10ee   :  { %v778_v56 = vshrl.u32 %v776_v55, 16 }
0x10f0   :  { %v780_v57 = vrot.slane %v778_v56, 2 }
0x10f2   :  { %781 = vrot.lane.b32.xlu0 %v780_v57, %s2017_s5 }
0x1164   :  { %v782_v58 = vpop.permute.xlu0 %781 }
0x1165   :  { %1801 = vmatmul.mubr.msk.bf16.vlgmr.msra.gmra.mxu0 %vm220_vm8, %v782_v58 }
0x1166   :  { %1813 = vmatpush3.bf16.msra.mxu0 %v2138_v48  ;;  %1816 = vmatprep.mubr.msk.bf16.mxu0 %vm2015_vm1, %v2014_v10 }
0x1167   :  { %1814 = vmatprep.subr.bf16.mxu0 %v2014_v10 }
0x116a   :  { %1815 = vmatpush3.bf16.msra.mxu0 %v2148_v51 }
0x116b   :  { %1828 = vmatprep.subr.bf16.mxu0 %v2014_v10 }
0x1225   :  { %v820_v59 = vpop.f32.mrf.mxu0 }
0x1226   :  { %v821_v60 = vadd.f32 %v820_v59, %v2179_v22 }
0x1227   :  { %v1802_v61 = vpop.f32.mrf.mxu0 }
0x1228   :  { %v827_v62 = vrot.slane %v821_v60, 2 }
0x1229   :  { %v823_v63 = vpop.f32.mrf.mxu0 }
0x122a   :  { %836 = vrot.lane.b32.xlu1 %v827_v62, %s2016_s4  ;;  %v829_v1 = vadd.f32 %v827_v62, %v2183_v28 }
0x122b   :  { %v1803_v0 = vpop.f32.mrf.mxu0 }
0x122c   :  { %v1618_v2 = vmul.f32 -1.442695, %v829_v1 }
0x122e   :  { %1930 = vpow2.f32 %v1618_v2 }
0x123b   :  { %v1931_v4 = vpop.eup %1930 }
0x123c   :  { %v833_v5 = vadd.f32 1.0, %v1931_v4 }
0x123e   :  { %1932 = vrcp.f32 %v833_v5 }
0x124b   :  { %v1933_v6 = vpop.eup %1932 }
0x124c   :  { %v846_v14 = vsub.f32 1.0, %v1933_v6  ;;  %v855_v16 = vmul.f32 %v1933_v6, %v853_v13 }
0x129c   :  { %v837_v7 = vpop.permute.xlu1 %836 }
0x129d   :  { %v839_v8 = vmul.f32 %v1933_v6, %v837_v7 }
0x129f   :  { %841 = vrot.lane.b32.xlu0 %v839_v8, %s2016_s4 }
0x1311   :  { %v842_v9 = vpop.permute.xlu0 %841 }
0x1312   :  { %v844_v11 = vadd.f32 %v842_v9, %v2183_v28 }
0x1314   :  { %1934 = vtanh.f32 %v844_v11 }
0x1321   :  { %v1935_v12 = vpop.eup %1934 }
0x1322   :  { %848 = vrot.lane.b32.xlu1 %v1935_v12, %s2017_s5 }
0x1394   :  { %v849_v15 = vpop.permute.xlu1 %848 }
0x1395   :  { %v851_v17 = vmul.f32 %v849_v15, %v846_v14 }
0x1397   :  { %v856_v3 = vadd.f32 %v855_v16, %v851_v17 }
0x1399   :  { %v857_v19 = vpack.c.bf16 %v856_v3, %v856_v3  ;;  %v932_v40 = vrot.slane %v856_v3, 7 }
0x139b   :  { %v859_v20 = vrot.slane %v857_v19, 3 }
0x139d   :  { %860 = vrot.lane.b32.xlu0 %v859_v20, %s2017_s5 }
0x140f   :  { %v861_v21 = vpop.permute.xlu0 %860 }
0x1410   :  { %1809 = vmatmul.mubr.msk.bf16.vlgmr.msra.gmra.mxu1 %vm220_vm8, %v861_v21 }
0x1411   :  { %1821 = vmatpush3.bf16.msra.mxu1 %v2138_v48  ;;  %1824 = vmatprep.mubr.msk.bf16.mxu1 %vm2015_vm1, %v2014_v10 }
0x1412   :  { %1822 = vmatprep.subr.bf16.mxu1 %v2014_v10 }
0x1415   :  { %1823 = vmatpush3.bf16.msra.mxu1 %v2148_v51 }
0x1416   :  { %1836 = vmatprep.subr.bf16.mxu1 %v2014_v10 }
0x14d0   :  { %v899_v23 = vpop.f32.mrf.mxu1 }
0x14d1   :  { %v900_v24 = vadd.f32 %v899_v23, %v2179_v22 }
0x14d2   :  { %v1810_v25 = vpop.f32.mrf.mxu1 }
0x14d3   :  { %v906_v26 = vrot.slane %v900_v24, 1 }
0x14d4   :  { %v902_v27 = vpop.f32.mrf.mxu1 }
0x14d5   :  { %915 = vrot.lane.b32.xlu1 %v906_v26, %s2016_s4  ;;  %v908_v30 = vadd.f32 %v906_v26, %v2183_v28 }
0x14d6   :  { %v1811_v29 = vpop.f32.mrf.mxu1 }
0x14d7   :  { %v1620_v31 = vmul.f32 -1.442695, %v908_v30 }
0x14d9   :  { %1936 = vpow2.f32 %v1620_v31 }
0x14e6   :  { %v1937_v32 = vpop.eup %1936 }
0x14e7   :  { %v912_v33 = vadd.f32 1.0, %v1937_v32 }
0x14e9   :  { %1938 = vrcp.f32 %v912_v33 }
0x14f6   :  { %v1939_v34 = vpop.eup %1938 }
0x14f7   :  { %v925_v41 = vsub.f32 1.0, %v1939_v34  ;;  %v934_v43 = vmul.f32 %v1939_v34, %v932_v40 }
0x1547   :  { %v916_v35 = vpop.permute.xlu1 %915 }
0x1548   :  { %v918_v36 = vmul.f32 %v1939_v34, %v916_v35 }
0x154a   :  { %920 = vrot.lane.b32.xlu0 %v918_v36, %s2016_s4 }
0x15bc   :  { %v921_v37 = vpop.permute.xlu0 %920 }
0x15bd   :  { %v923_v38 = vadd.f32 %v921_v37, %v2183_v28 }
0x15bf   :  { %1940 = vtanh.f32 %v923_v38 }
0x15cc   :  { %v1941_v39 = vpop.eup %1940 }
0x15cd   :  { %927 = vrot.lane.b32.xlu1 %v1941_v39, %s2017_s5 }
0x163f   :  { %v928_v42 = vpop.permute.xlu1 %927 }
0x1640   :  { %v930_v44 = vmul.f32 %v928_v42, %v925_v41 }
0x1642   :  { %v935_v45 = vadd.f32 %v934_v43, %v930_v44 }
0x1644   :  { %v936_v46 = vpack.c.bf16 %v935_v45, %v935_v45  ;;  %v1011_v2 = vrot.slane %v935_v45, 7 }
0x1646   :  { %v938_v47 = vshrl.u32 %v936_v46, 16 }
0x1648   :  { %v940_v49 = vrot.slane %v938_v47, 3 }
0x164a   :  { %941 = vrot.lane.b32.xlu0 %v940_v49, %s2017_s5 }
0x16bc   :  { %v942_v50 = vpop.permute.xlu0 %941 }
0x16bd   :  { %1817 = vmatmul.mubr.msk.bf16.vlgmr.msra.gmra.mxu0 %vm220_vm8, %v942_v50 }
0x16be   :  { %1829 = vmatpush3.bf16.msra.mxu0 %v2138_v48  ;;  %1832 = vmatprep.mubr.msk.bf16.mxu0 %vm2015_vm1, %v2014_v10 }
0x16bf   :  { %1830 = vmatprep.subr.bf16.mxu0 %v2014_v10 }
0x16c2   :  { %1831 = vmatpush3.bf16.msra.mxu0 %v2148_v51 }
0x16c3   :  { %1844 = vmatprep.subr.bf16.mxu0 %v2014_v10 }
0x177d   :  { %v980_v28 = vpop.f32.mrf.mxu0 }
0x177e   :  { %v981_v52 = vadd.f32 %v980_v28, %v2179_v22 }
0x177f   :  { %v1818_v53 = vpop.f32.mrf.mxu0 }
0x1780   :  { %994 = vrot.lane.b32.xlu1 %v981_v52, %s2016_s4  ;;  %v986_v56 = vadd.f32 %v981_v52, %v2174_v18 }
0x1781   :  { %v983_v54 = vpop.f32.mrf.mxu0 }
0x1782   :  { %v1622_v57 = vmul.f32 -1.442695, %v986_v56 }
0x1783   :  { %v1819_v55 = vpop.f32.mrf.mxu0 }
0x1784   :  { %1942 = vpow2.f32 %v1622_v57 }
0x1791   :  { %v1943_v58 = vpop.eup %1942 }
0x1792   :  { %v990_v59 = vadd.f32 1.0, %v1943_v58 }
0x1794   :  { %1944 = vrcp.f32 %v990_v59 }
0x17a1   :  { %v1945_v60 = vpop.eup %1944 }
0x17a2   :  { %v1004_v4 = vsub.f32 1.0, %v1945_v60  ;;  %v1013_v6 = vmul.f32 %v1945_v60, %v1011_v2 }
0x17f2   :  { %v995_v61 = vpop.permute.xlu1 %994 }
0x17f3   :  { %v997_v62 = vmul.f32 %v1945_v60, %v995_v61 }
0x17f5   :  { %999 = vrot.lane.b32.xlu0 %v997_v62, %s2016_s4 }
0x1867   :  { %v1000_v63 = vpop.permute.xlu0 %999 }
0x1868   :  { %v1002_v0 = vadd.f32 %v1000_v63, %v2174_v18 }
0x186a   :  { %1946 = vtanh.f32 %v1002_v0 }
0x1877   :  { %v1947_v1 = vpop.eup %1946 }
0x1878   :  { %1006 = vrot.lane.b32.xlu1 %v1947_v1, %s2017_s5 }
0x18ea   :  { %v1007_v5 = vpop.permute.xlu1 %1006 }
0x18eb   :  { %v1009_v7 = vmul.f32 %v1007_v5, %v1004_v4 }
0x18ed   :  { %v1014_v8 = vadd.f32 %v1013_v6, %v1009_v7 }
0x18ef   :  { %v1015_v9 = vpack.c.bf16 %v1014_v8, %v1014_v8  ;;  %v1089_v30 = vrot.slane %v1014_v8, 7 }
0x18f1   :  { %1017 = vrot.lane.b32.xlu0 %v1015_v9, %s2017_s5 }
0x1963   :  { %v1018_v11 = vpop.permute.xlu0 %1017 }
0x1964   :  { %1825 = vmatmul.mubr.msk.bf16.vlgmr.msra.gmra.mxu1 %vm220_vm8, %v1018_v11 }
0x1965   :  { %1837 = vmatpush3.bf16.msra.mxu1 %v2138_v48  ;;  %1840 = vmatprep.mubr.msk.bf16.mxu1 %vm2015_vm1, %v2014_v10 }
0x1966   :  { %1838 = vmatprep.subr.bf16.mxu1 %v2014_v10 }
0x1969   :  { %1839 = vmatpush3.bf16.msra.mxu1 %v2148_v51 }
0x196a   :  { %1852 = vmatprep.subr.bf16.mxu1 %v2014_v10 }
0x1a24   :  { %v1056_v12 = vpop.f32.mrf.mxu1 }
0x1a25   :  { %v1057_v13 = vadd.f32 %v1056_v12, %v2179_v22 }
0x1a26   :  { %v1826_v14 = vpop.f32.mrf.mxu1 }
0x1a27   :  { %v1063_v15 = vrot.slane %v1057_v13, 7 }
0x1a28   :  { %v1059_v16 = vpop.f32.mrf.mxu1 }
0x1a29   :  { %1072 = vrot.lane.b32.xlu1 %v1063_v15, %s2016_s4  ;;  %v1065_v3 = vadd.f32 %v1063_v15, %v2174_v18 }
0x1a2a   :  { %v1827_v17 = vpop.f32.mrf.mxu1 }
0x1a2b   :  { %v1624_v19 = vmul.f32 -1.442695, %v1065_v3 }
0x1a2d   :  { %1948 = vpow2.f32 %v1624_v19 }
0x1a3a   :  { %v1949_v20 = vpop.eup %1948 }
0x1a3b   :  { %v1069_v21 = vadd.f32 1.0, %v1949_v20 }
0x1a3d   :  { %1950 = vrcp.f32 %v1069_v21 }
0x1a4a   :  { %v1951_v23 = vpop.eup %1950 }
0x1a4b   :  { %v1082_v31 = vsub.f32 1.0, %v1951_v23  ;;  %v1091_v33 = vmul.f32 %v1951_v23, %v1089_v30 }
0x1a9b   :  { %v1073_v24 = vpop.permute.xlu1 %1072 }
0x1a9c   :  { %v1075_v25 = vmul.f32 %v1951_v23, %v1073_v24 }
0x1a9e   :  { %1077 = vrot.lane.b32.xlu0 %v1075_v25, %s2016_s4 }
0x1b10   :  { %v1078_v26 = vpop.permute.xlu0 %1077 }
0x1b11   :  { %v1080_v27 = vadd.f32 %v1078_v26, %v2174_v18 }
0x1b13   :  { %1952 = vtanh.f32 %v1080_v27 }
0x1b20   :  { %v1953_v29 = vpop.eup %1952 }
0x1b21   :  { %1084 = vrot.lane.b32.xlu1 %v1953_v29, %s2017_s5 }
0x1b93   :  { %v1085_v32 = vpop.permute.xlu1 %1084 }
0x1b94   :  { %v1087_v34 = vmul.f32 %v1085_v32, %v1082_v31 }
0x1b96   :  { %v1092_v35 = vadd.f32 %v1091_v33, %v1087_v34 }
0x1b98   :  { %v1093_v36 = vpack.c.bf16 %v1092_v35, %v1092_v35  ;;  %v1169_v56 = vrot.slane %v1092_v35, 7 }
0x1b9a   :  { %v1095_v37 = vshrl.u32 %v1093_v36, 16 }
0x1b9c   :  { %1097 = vrot.lane.b32.xlu0 %v1095_v37, %s2017_s5 }
0x1c0e   :  { %v1098_v38 = vpop.permute.xlu0 %1097 }
0x1c0f   :  { %1833 = vmatmul.mubr.msk.bf16.vlgmr.msra.gmra.mxu0 %vm220_vm8, %v1098_v38 }
0x1c10   :  { %1845 = vmatpush3.bf16.msra.mxu0 %v2138_v48  ;;  %1848 = vmatprep.mubr.msk.bf16.mxu0 %vm2015_vm1, %v2014_v10 }
0x1c11   :  { %1846 = vmatprep.subr.bf16.mxu0 %v2014_v10 }
0x1c14   :  { %1847 = vmatpush3.bf16.msra.mxu0 %v2148_v51 }
0x1c15   :  { %1860 = vmatprep.subr.bf16.mxu0 %v2014_v10 }
0x1ccf   :  { %v1136_v39 = vpop.f32.mrf.mxu0 }
0x1cd0   :  { %v1137_v40 = vadd.f32 %v1136_v39, %v2179_v22 }
0x1cd1   :  { %v1834_v41 = vpop.f32.mrf.mxu0 }
0x1cd2   :  { %v1143_v42 = vrot.slane %v1137_v40, 6 }
0x1cd3   :  { %v1139_v43 = vpop.f32.mrf.mxu0 }
0x1cd4   :  { %1152 = vrot.lane.b32.xlu1 %v1143_v42, %s2016_s4  ;;  %v1145_v45 = vadd.f32 %v1143_v42, %v2174_v18 }
0x1cd5   :  { %v1835_v44 = vpop.f32.mrf.mxu0 }
0x1cd6   :  { %v1626_v46 = vmul.f32 -1.442695, %v1145_v45 }
0x1cd8   :  { %1954 = vpow2.f32 %v1626_v46 }
0x1ce5   :  { %v1955_v47 = vpop.eup %1954 }
0x1ce6   :  { %v1149_v49 = vadd.f32 1.0, %v1955_v47 }
0x1ce8   :  { %1956 = vrcp.f32 %v1149_v49 }
0x1cf5   :  { %v1957_v50 = vpop.eup %1956 }
0x1cf6   :  { %v1162_v57 = vsub.f32 1.0, %v1957_v50  ;;  %v1171_v59 = vmul.f32 %v1957_v50, %v1169_v56 }
0x1d46   :  { %v1153_v28 = vpop.permute.xlu1 %1152 }
0x1d47   :  { %v1155_v52 = vmul.f32 %v1957_v50, %v1153_v28 }
0x1d49   :  { %1157 = vrot.lane.b32.xlu0 %v1155_v52, %s2016_s4 }
0x1dbb   :  { %v1158_v53 = vpop.permute.xlu0 %1157 }
0x1dbc   :  { %v1160_v54 = vadd.f32 %v1158_v53, %v2174_v18 }
0x1dbe   :  { %1958 = vtanh.f32 %v1160_v54 }
0x1dcb   :  { %v1959_v55 = vpop.eup %1958 }
0x1dcc   :  { %1164 = vrot.lane.b32.xlu1 %v1959_v55, %s2017_s5 }
0x1e3e   :  { %v1165_v58 = vpop.permute.xlu1 %1164 }
0x1e3f   :  { %v1167_v60 = vmul.f32 %v1165_v58, %v1162_v57 }
0x1e41   :  { %v1172_v61 = vadd.f32 %v1171_v59, %v1167_v60 }
0x1e43   :  { %v1173_v62 = vpack.c.bf16 %v1172_v61, %v1172_v61  ;;  %v1248_v19 = vrot.slane %v1172_v61, 7 }
0x1e45   :  { %v1175_v63 = vrot.slane %v1173_v62, 1 }
0x1e47   :  { %1176 = vrot.lane.b32.xlu0 %v1175_v63, %s2017_s5 }
0x1eb9   :  { %v1177_v0 = vpop.permute.xlu0 %1176 }
0x1eba   :  { %1841 = vmatmul.mubr.msk.bf16.vlgmr.msra.gmra.mxu1 %vm220_vm8, %v1177_v0 }
0x1ebb   :  { %1853 = vmatpush3.bf16.msra.mxu1 %v2138_v48  ;;  %1856 = vmatprep.mubr.msk.bf16.mxu1 %vm2015_vm1, %v2014_v10 }
0x1ebc   :  { %1854 = vmatprep.subr.bf16.mxu1 %v2014_v10 }
0x1ebf   :  { %1855 = vmatpush3.bf16.msra.mxu1 %v2148_v51 }
0x1ec0   :  { %1868 = vmatprep.subr.bf16.mxu1 %v2014_v10 }
0x1f7a   :  { %v1215_v1 = vpop.f32.mrf.mxu1 }
0x1f7b   :  { %v1216_v2 = vadd.f32 %v1215_v1, %v2179_v22 }
0x1f7c   :  { %v1842_v4 = vpop.f32.mrf.mxu1 }
0x1f7d   :  { %v1222_v5 = vrot.slane %v1216_v2, 5 }
0x1f7e   :  { %v1218_v6 = vpop.f32.mrf.mxu1 }
0x1f7f   :  { %1231 = vrot.lane.b32.xlu1 %v1222_v5, %s2016_s4  ;;  %v1224_v8 = vadd.f32 %v1222_v5, %v2174_v18 }
0x1f80   :  { %v1843_v7 = vpop.f32.mrf.mxu1 }
0x1f81   :  { %v1628_v9 = vmul.f32 -1.442695, %v1224_v8 }
0x1f83   :  { %1960 = vpow2.f32 %v1628_v9 }
0x1f90   :  { %v1961_v11 = vpop.eup %1960 }
0x1f91   :  { %v1228_v12 = vadd.f32 1.0, %v1961_v11 }
0x1f93   :  { %1962 = vrcp.f32 %v1228_v12 }
0x1fa0   :  { %v1963_v13 = vpop.eup %1962 }
0x1fa1   :  { %v1241_v20 = vsub.f32 1.0, %v1963_v13  ;;  %v1250_v23 = vmul.f32 %v1963_v13, %v1248_v19 }
0x1ff1   :  { %v1232_v14 = vpop.permute.xlu1 %1231 }
0x1ff2   :  { %v1234_v15 = vmul.f32 %v1963_v13, %v1232_v14 }
0x1ff4   :  { %1236 = vrot.lane.b32.xlu0 %v1234_v15, %s2016_s4 }
0x2066   :  { %v1237_v16 = vpop.permute.xlu0 %1236 }
0x2067   :  { %v1239_v17 = vadd.f32 %v1237_v16, %v2174_v18 }
0x2069   :  { %1964 = vtanh.f32 %v1239_v17 }
0x2076   :  { %v1965_v3 = vpop.eup %1964 }
0x2077   :  { %1243 = vrot.lane.b32.xlu1 %v1965_v3, %s2017_s5  ;;  %v1990_v3 = vld [vmem:[%s2390_s0 + $0x80] sm:$0x1]  ;;  %s2018_s0 = smov [#allocation2]  }
0x2078   :  { %s1584_s8 = sshll.u32 %s2018_s0, 4  ;;  %s1585_s8 = int_to_ptr.vmem [resolvable:$true] %s1584_s8 }
0x2079   :  { %s1991_s9 = scalar_lea.vmem %s1585_s8, 16  ;;  %s1995_s10 = scalar_lea.vmem %s1585_s8, 32 }
0x207a   :  { %p1992_p0 = scmp.ne.s32.totalorder %s1585_s8, %s1991_s9  ;;  %p1996_p1 = scmp.lt.s32.totalorder %s1585_s8, %s1585_s8 }
0x207b   :  { %p1997_p2 = scmp.lt.s32.totalorder %s1995_s10, %s1991_s9 }
0x207d   :  { %p1998_p3 = por %p1997_p2, %p1996_p1 }
0x207f   :  { %p1999_p4 = pnand %p1998_p3, %p1992_p0 }
0x20e9   :  { %v1244_v21 = vpop.permute.xlu1 %1243 }
0x20ea   :  { %v1246_v24 = vmul.f32 %v1244_v21, %v1241_v20 }
0x20ec   :  { %v1251_v25 = vadd.f32 %v1250_v23, %v1246_v24 }
0x20ee   :  { %v1252_v26 = vpack.c.bf16 %v1251_v25, %v1251_v25  ;;  %v1329_v47 = vrot.slane %v1251_v25, 7 }
0x20f0   :  { %v1254_v27 = vshrl.u32 %v1252_v26, 16 }
0x20f2   :  { %v1256_v29 = vrot.slane %v1254_v27, 1 }
0x20f4   :  { %1257 = vrot.lane.b32.xlu0 %v1256_v29, %s2017_s5 }
0x2166   :  { %v1258_v30 = vpop.permute.xlu0 %1257 }
0x2167   :  { %1849 = vmatmul.mubr.msk.bf16.vlgmr.msra.gmra.mxu0 %vm220_vm8, %v1258_v30 }
0x2168   :  { %1861 = vmatpush3.bf16.msra.mxu0 %v2138_v48  ;;  %1864 = vmatprep.mubr.msk.bf16.mxu0 %vm2015_vm1, %v2014_v10 }
0x2169   :  { %1862 = vmatprep.subr.bf16.mxu0 %v2014_v10 }
0x216c   :  { %1863 = vmatpush3.bf16.msra.mxu0 %v2148_v51 }
0x2227   :  { %v1296_v31 = vpop.f32.mrf.mxu0 }
0x2228   :  { %v1297_v32 = vadd.f32 %v1296_v31, %v2179_v22 }
0x2229   :  { %v1850_v33 = vpop.f32.mrf.mxu0 }
0x222a   :  { %v1303_v34 = vrot.slane %v1297_v32, 4 }
0x222b   :  { %v1299_v35 = vpop.f32.mrf.mxu0 }
0x222c   :  { %1312 = vrot.lane.b32.xlu1 %v1303_v34, %s2016_s4  ;;  %v1305_v37 = vadd.f32 %v1303_v34, %v2174_v18 }
0x222d   :  { %v1851_v36 = vpop.f32.mrf.mxu0 }
0x222e   :  { %v1630_v38 = vmul.f32 -1.442695, %v1305_v37 }
0x2230   :  { %1966 = vpow2.f32 %v1630_v38 }
0x223d   :  { %v1967_v39 = vpop.eup %1966 }
0x223e   :  { %v1309_v40 = vadd.f32 1.0, %v1967_v39 }
0x2240   :  { %1968 = vrcp.f32 %v1309_v40 }
0x224d   :  { %v1969_v41 = vpop.eup %1968 }
0x224e   :  { %v1322_v49 = vsub.f32 1.0, %v1969_v41  ;;  %v1331_v28 = vmul.f32 %v1969_v41, %v1329_v47 }
0x229e   :  { %v1313_v42 = vpop.permute.xlu1 %1312 }
0x229f   :  { %v1315_v43 = vmul.f32 %v1969_v41, %v1313_v42 }
0x22a1   :  { %1317 = vrot.lane.b32.xlu0 %v1315_v43, %s2016_s4 }
0x2313   :  { %v1318_v44 = vpop.permute.xlu0 %1317 }
0x2314   :  { %v1320_v45 = vadd.f32 %v1318_v44, %v2174_v18 }
0x2316   :  { %1970 = vtanh.f32 %v1320_v45 }
0x2323   :  { %v1971_v46 = vpop.eup %1970 }
0x2324   :  { %1324 = vrot.lane.b32.xlu1 %v1971_v46, %s2017_s5 }
0x2396   :  { %v1325_v50 = vpop.permute.xlu1 %1324 }
0x2397   :  { %v1327_v52 = vmul.f32 %v1325_v50, %v1322_v49 }
0x2399   :  { %v1332_v53 = vadd.f32 %v1331_v28, %v1327_v52 }
0x239b   :  { %v1333_v54 = vpack.c.bf16 %v1332_v53, %v1332_v53  ;;  %v1408_v6 = vrot.slane %v1332_v53, 7 }
0x239d   :  { %v1335_v55 = vrot.slane %v1333_v54, 2 }
0x239f   :  { %1336 = vrot.lane.b32.xlu0 %v1335_v55, %s2017_s5 }
0x2411   :  { %v1337_v56 = vpop.permute.xlu0 %1336 }
0x2412   :  { %1857 = vmatmul.mubr.msk.bf16.vlgmr.msra.gmra.mxu1 %vm220_vm8, %v1337_v56 }
0x2413   :  { %1869 = vmatpush3.bf16.msra.mxu1 %v2138_v48  ;;  %1872 = vmatprep.mubr.msk.bf16.mxu1 %vm2015_vm1, %v2014_v10 }
0x2414   :  { %1870 = vmatprep.subr.bf16.mxu1 %v2014_v10 }
0x2417   :  { %1871 = vmatpush3.bf16.msra.mxu1 %v2148_v51 }
0x24d2   :  { %v1375_v57 = vpop.f32.mrf.mxu1 }
0x24d3   :  { %v1376_v58 = vadd.f32 %v1375_v57, %v2179_v22 }
0x24d4   :  { %v1858_v59 = vpop.f32.mrf.mxu1 }
0x24d5   :  { %v1382_v60 = vrot.slane %v1376_v58, 3 }
0x24d6   :  { %v1378_v61 = vpop.f32.mrf.mxu1 }
0x24d7   :  { %1391 = vrot.lane.b32.xlu1 %v1382_v60, %s2016_s4  ;;  %v1384_v63 = vadd.f32 %v1382_v60, %v2174_v18 }
0x24d8   :  { %v1859_v62 = vpop.f32.mrf.mxu1 }
0x24d9   :  { %v1632_v0 = vmul.f32 -1.442695, %v1384_v63 }
0x24db   :  { %1972 = vpow2.f32 %v1632_v0 }
0x24e8   :  { %v1973_v48 = vpop.eup %1972 }
0x24e9   :  { %v1388_v1 = vadd.f32 1.0, %v1973_v48 }
0x24eb   :  { %1974 = vrcp.f32 %v1388_v1 }
0x24f8   :  { %v1975_v2 = vpop.eup %1974 }
0x24f9   :  { %v1401_v7 = vsub.f32 1.0, %v1975_v2  ;;  %v1410_v9 = vmul.f32 %v1975_v2, %v1408_v6 }
0x2549   :  { %v1392_v10 = vpop.permute.xlu1 %1391 }
0x254a   :  { %v1394_v4 = vmul.f32 %v1975_v2, %v1392_v10 }
0x254c   :  { %1396 = vrot.lane.b32.xlu0 %v1394_v4, %s2016_s4 }
0x25be   :  { %v1397_v51 = vpop.permute.xlu0 %1396 }
0x25bf   :  { %v1399_v22 = vadd.f32 %v1397_v51, %v2174_v18 }
0x25c1   :  { %1976 = vtanh.f32 %v1399_v22 }
0x25ce   :  { %v1977_v5 = vpop.eup %1976 }
0x25cf   :  { %1403 = vrot.lane.b32.xlu1 %v1977_v5, %s2017_s5 }
0x2641   :  { %v1404_v8 = vpop.permute.xlu1 %1403 }
0x2642   :  { %v1406_v11 = vmul.f32 %v1404_v8, %v1401_v7 }
0x2644   :  { %v1411_v12 = vadd.f32 %v1410_v9, %v1406_v11 }
0x2646   :  { %v1412_v13 = vpack.c.bf16 %v1411_v12, %v1411_v12  ;;  %v1489_v36 = vrot.slane %v1411_v12, 7 }
0x2648   :  { %v1414_v14 = vshrl.u32 %v1412_v13, 16 }
0x264a   :  { %v1416_v15 = vrot.slane %v1414_v14, 2 }
0x264c   :  { %1417 = vrot.lane.b32.xlu0 %v1416_v15, %s2017_s5 }
0x26be   :  { %v1418_v16 = vpop.permute.xlu0 %1417 }
0x26bf   :  { %1865 = vmatmul.mubr.msk.bf16.vlgmr.msra.gmra.mxu0 %vm220_vm8, %v1418_v16 }
0x277f   :  { %v1456_v17 = vpop.f32.mrf.mxu0 }
0x2780   :  { %v1457_v19 = vadd.f32 %v1990_v3, %v1456_v17 }
0x2781   :  { %v1866_v20 = vpop.f32.mrf.mxu0 }
0x2782   :  { %v1463_v21 = vrot.slane %v1457_v19, 2 }
0x2783   :  { %v1459_v23 = vpop.f32.mrf.mxu0 }
0x2784   :  { %1472 = vrot.lane.b32.xlu1 %v1463_v21, %s2016_s4  ;;  %v1465_v25 = vadd.f32 %v1463_v21, %v2174_v18 }
0x2785   :  { %v1867_v24 = vpop.f32.mrf.mxu0 }
0x2786   :  { %v1634_v26 = vmul.f32 -1.442695, %v1465_v25 }
0x2788   :  { %1978 = vpow2.f32 %v1634_v26 }
0x2795   :  { %v1979_v27 = vpop.eup %1978 }
0x2796   :  { %v1469_v29 = vadd.f32 1.0, %v1979_v27 }
0x2798   :  { %1980 = vrcp.f32 %v1469_v29 }
0x27a5   :  { %v1981_v30 = vpop.eup %1980 }
0x27a6   :  { %v1482_v37 = vsub.f32 1.0, %v1981_v30  ;;  %v1491_v39 = vmul.f32 %v1981_v30, %v1489_v36 }
0x27f6   :  { %v1473_v31 = vpop.permute.xlu1 %1472 }
0x27f7   :  { %v1475_v32 = vmul.f32 %v1981_v30, %v1473_v31 }
0x27f9   :  { %1477 = vrot.lane.b32.xlu0 %v1475_v32, %s2016_s4 }
0x286b   :  { %v1478_v33 = vpop.permute.xlu0 %1477 }
0x286c   :  { %v1480_v34 = vadd.f32 %v1478_v33, %v2174_v18 }
0x286e   :  { %1982 = vtanh.f32 %v1480_v34 }
0x287b   :  { %v1983_v35 = vpop.eup %1982 }
0x287c   :  { %1484 = vrot.lane.b32.xlu1 %v1983_v35, %s2017_s5 }
0x28ee   :  { %v1485_v38 = vpop.permute.xlu1 %1484 }
0x28ef   :  { %v1487_v40 = vmul.f32 %v1485_v38, %v1482_v37 }
0x28f1   :  { %v1492_v41 = vadd.f32 %v1491_v39, %v1487_v40 }
0x28f3   :  { %v1493_v42 = vpack.c.bf16 %v1492_v41, %v1492_v41  ;;  %v1568_v62 = vrot.slane %v1492_v41, 7 }
0x28f5   :  { %v1495_v43 = vrot.slane %v1493_v42, 3 }
0x28f7   :  { %1496 = vrot.lane.b32.xlu0 %v1495_v43, %s2017_s5 }
0x2969   :  { %v1497_v44 = vpop.permute.xlu0 %1496 }
0x296a   :  { %1873 = vmatmul.mubr.msk.bf16.vlgmr.msra.gmra.mxu1 %vm220_vm8, %v1497_v44 }
0x2a2a   :  { %v1535_v45 = vpop.f32.mrf.mxu1 }
0x2a2b   :  { %v1536_v46 = vadd.f32 %v1990_v3, %v1535_v45 }
0x2a2c   :  { %v1874_v47 = vpop.f32.mrf.mxu1 }
0x2a2d   :  { %v1542_v49 = vrot.slane %v1536_v46, 1 }
0x2a2e   :  { %v1538_v50 = vpop.f32.mrf.mxu1 }
0x2a2f   :  { %1551 = vrot.lane.b32.xlu1 %v1542_v49, %s2016_s4  ;;  %v1544_v52 = vadd.f32 %v1542_v49, %v2174_v18 }
0x2a30   :  { %v1875_v28 = vpop.f32.mrf.mxu1 }
0x2a31   :  { %v1636_v53 = vmul.f32 -1.442695, %v1544_v52 }
0x2a33   :  { %1984 = vpow2.f32 %v1636_v53 }
0x2a40   :  { %v1985_v54 = vpop.eup %1984 }
0x2a41   :  { %v1548_v55 = vadd.f32 1.0, %v1985_v54 }
0x2a43   :  { %1986 = vrcp.f32 %v1548_v55 }
0x2a50   :  { %v1987_v56 = vpop.eup %1986 }
0x2a51   :  { %v1561_v63 = vsub.f32 1.0, %v1987_v56  ;;  %v1570_v48 = vmul.f32 %v1987_v56, %v1568_v62 }
0x2aa1   :  { %v1552_v57 = vpop.permute.xlu1 %1551 }
0x2aa2   :  { %v1554_v58 = vmul.f32 %v1987_v56, %v1552_v57 }
0x2aa4   :  { %1556 = vrot.lane.b32.xlu0 %v1554_v58, %s2016_s4 }
0x2b16   :  { %v1557_v59 = vpop.permute.xlu0 %1556 }
0x2b17   :  { %v1559_v60 = vadd.f32 %v1557_v59, %v2174_v18 }
0x2b19   :  { %1988 = vtanh.f32 %v1559_v60 }
0x2b26   :  { %v1989_v61 = vpop.eup %1988 }
0x2b27   :  { %1563 = vrot.lane.b32.xlu1 %v1989_v61, %s2017_s5 }
0x2b99   :  { %v1564_v0 = vpop.permute.xlu1 %1563 }
0x2b9a   :  { %v1566_v1 = vmul.f32 %v1564_v0, %v1561_v63 }
0x2b9c   :  { %v1571_v2 = vadd.f32 %v1570_v48, %v1566_v1 }
0x2b9e   :  { %1573 = vrot.lane.b32.xlu0 %v1571_v2, %s2017_s5 }
0x2c10   :  { %v1574_v10 = vpop.permute.xlu0 %1573 }
0x2c11   :  { %1577 = vst.msk [vmem:[#allocation2 - $0x7] sm:$0x80] %vm1576_vm9, %v1574_v10 }
0x2c12   :  { %2002 = shalt.err (!%p1999_p4)
}
0x2c13   :  { %1587 = dma.vmem_to_hbm [thread:$0]  %s1585_s8, 16, %s2392_s2, [#allocation3]  }
0x2c14   :  { %2011 = dma.done.wait [#allocation3], 16  }
0x2c15   :  { %2012 = vsyncadd [#allocation3], 4294967280 }
0x2c16   :  { %1591 = vsyncpa [#allocation3], 1 }

</bundles_post_ra>
